<compile_context>
chip_gen: v7x
topology: tpu7x:2x2x1
jax: 0.10.0
libtpu: 0.0.40
codegen_flags: <defaults>
</compile_context>

<pallas_src>
import jax
import jax.numpy as jnp
from jax.experimental import pallas as pl
from jax.experimental.pallas import tpu as pltpu

EPS = 1e-5

D_IN = 1024
D_H1 = 512
D_H2 = 128
D_OUT = 64
D_OUT_PAD = 128  # lane-dense padded output width


def rh2_kernel(x_ref, q1_ref, p1_ref, q2_ref, p2_ref, w3_ref, out_ref):
    x = x_ref[...]                                   # [B, 1024] f32

    # Packed small params (one DMA each instead of eight separate ones).
    p1 = p1_ref[...]                                 # [4, 512] f32
    b1s, g1, beta1, s1 = p1[0:1], p1[1:2], p1[2:3], p1[3:4]   # b1/s1, gamma1, beta1, s1
    p2 = p2_ref[...]                                 # [5, 128] f32
    b2s, g2, beta2, s2, b3 = p2[0:1], p2[1:2], p2[2:3], p2[3:4], p2[4:5]

    # ---- dense1: int8 weights dequantized to bf16 on the VPU (MXU sees bf16;
    # portable to v7x which has no int MXU path).  Per-channel scale s1 is NOT
    # applied here; it is folded into the BN affine below (ReLU is
    # positive-homogeneous, so relu(dense1)/s1 == relu(x@q1 + b1/s1)).
    w1 = q1_ref[...].astype(jnp.float32).astype(jnp.bfloat16)
    u1 = jnp.dot(x.astype(jnp.bfloat16), w1,
                 preferred_element_type=jnp.float32) + b1s
    u1 = jnp.maximum(u1, 0.0)                        # [B, 512] == relu(dense1(x)) / s1

    # ---- batch_norm1 (training-mode batch stats) folded with the dequant scale:
    # BN(s1*u1) == scale1*u1 + shift1.
    mean1 = jnp.mean(u1, axis=0, keepdims=True)
    d1 = u1 - mean1
    var1 = jnp.mean(d1 * d1, axis=0, keepdims=True)
    scale1 = g1 * s1 * jax.lax.rsqrt(s1 * s1 * var1 + EPS)     # [1, 512]
    shift1 = beta1 - mean1 * scale1
    h1 = u1 * scale1 + shift1                        # == batch_norm1(relu(dense1(x)))

    # ---- dense2 (int8, same dequant-scale fold) + relu ----------------------
    w2 = q2_ref[...].astype(jnp.float32).astype(jnp.bfloat16)
    u2 = jnp.dot(h1.astype(jnp.bfloat16), w2,
                 preferred_element_type=jnp.float32) + b2s
    u2 = jnp.maximum(u2, 0.0)                        # [B, 128] == relu(dense2(h1)) / s2

    # ---- batch_norm2 (over the actual 128 features), folded affine ----------
    mean2 = jnp.mean(u2, axis=0, keepdims=True)
    d2 = u2 - mean2
    var2 = jnp.mean(d2 * d2, axis=0, keepdims=True)
    scale2 = g2 * s2 * jax.lax.rsqrt(s2 * s2 * var2 + EPS)     # [1, 128]
    shift2 = beta2 - mean2 * scale2
    h2 = u2 * scale2 + shift2

    # ---- dense3 (bf16, padded to 128 lane-dense cols) + sigmoid --------------
    z = jnp.dot(h2.astype(jnp.bfloat16), w3_ref[...],
                preferred_element_type=jnp.float32) + b3       # [B, 128]
    # sigmoid(z) = 0.5 * (tanh(z/2) + 1): single EUP op, exact range [0, 1].
    out_ref[...] = 0.5 * (jnp.tanh(0.5 * z) + 1.0)


def rh2_forward(x, packed_params):
    B = x.shape[0]
    q1, p1, q2, p2, w3 = packed_params

    flops = 2 * B * (D_IN * D_H1 + D_H1 * D_H2 + D_H2 * D_OUT_PAD)
    transcendentals = B * D_OUT_PAD + (D_H1 + D_H2)            # tanh + rsqrt
    bytes_accessed = (
        D_IN * D_H1 + D_H1 * D_H2                              # int8 weights
        + 2 * D_H2 * D_OUT_PAD                                 # bf16 w3
        + 4 * (4 * D_H1 + 5 * D_H2)                            # packed f32 param slabs
        + 4 * (B * D_IN + B * D_OUT_PAD)                       # x in, out
    )

    out_padded = pl.pallas_call(
        rh2_kernel,
        out_shape=jax.ShapeDtypeStruct((B, D_OUT_PAD), jnp.float32),
        # No grid: small batch + all weights (~0.6 MiB) fit comfortably in VMEM
        # as single blocks; training-mode BN needs the full batch anyway.  See
        # TODO(synk) at top for the large-B batch-grid / eval-BN variant.
        in_specs=[pl.BlockSpec(memory_space=pltpu.MemorySpace.VMEM)] * 6,
        out_specs=pl.BlockSpec(memory_space=pltpu.MemorySpace.VMEM),
        cost_estimate=pl.CostEstimate(
            flops=flops,
            transcendentals=transcendentals,
            bytes_accessed=bytes_accessed,
        ),
    )(x, q1, p1, q2, p2, w3)
    # Drop the lane-padding back to the module's 64-wide output.
    return out_padded[:, :D_OUT]


# --------------------------------------------------------------------------- #
# Parameter construction / packing
# --------------------------------------------------------------------------- #

def init_float_params(key):
    ks = jax.random.split(key, 6)
    return dict(
        w1=jax.random.normal(ks[0], (D_IN, D_H1), jnp.float32) * 0.02,
        b1=jax.random.normal(ks[1], (D_H1,), jnp.float32) * 0.01,
        w2=jax.random.normal(ks[2], (D_H1, D_H2), jnp.float32) * 0.02,
        b2=jax.random.normal(ks[3], (D_H2,), jnp.float32) * 0.01,
        w3=jax.random.normal(ks[4], (D_H2, D_OUT), jnp.float32) * 0.02,
        b3=jax.random.normal(ks[5], (D_OUT,), jnp.float32) * 0.01,
        # BatchNorm affine defaults: gamma=1, beta=0.
        g1=jnp.ones((D_H1,), jnp.float32), beta1=jnp.zeros((D_H1,), jnp.float32),
        g2=jnp.ones((D_H2,), jnp.float32), beta2=jnp.zeros((D_H2,), jnp.float32),
    )


def _quantize_int8(w):
    """Symmetric per-output-channel int8 quantization: w ~= q * s."""
    s = jnp.maximum(jnp.max(jnp.abs(w), axis=0, keepdims=True), 1e-12) / 127.0
    q = jnp.clip(jnp.round(w / s), -127.0, 127.0).astype(jnp.int8)
    return q, s


def pack_params(fp):
    q1, s1 = _quantize_int8(fp["w1"])
    q2, s2 = _quantize_int8(fp["w2"])
    # Slab 1: [4, 512] = b1/s1, gamma1, beta1, s1.
    p1 = jnp.stack([fp["b1"] / s1[0], fp["g1"], fp["beta1"], s1[0]], axis=0)
    # Slab 2: [5, 128] = b2/s2, gamma2, beta2, s2, b3 (lane-padded to 128).
    b3_pad = jnp.zeros((D_OUT_PAD,), jnp.float32).at[:D_OUT].set(fp["b3"])
    p2 = jnp.stack([fp["b2"] / s2[0], fp["g2"], fp["beta2"], s2[0], b3_pad], axis=0)
    # dense3 padded to 128 output columns (zeros) for lane-dense stores, bf16.
    w3_pad = (jnp.zeros((D_H2, D_OUT_PAD), jnp.float32)
              .at[:, :D_OUT].set(fp["w3"]).astype(jnp.bfloat16))
    return (q1, p1, q2, p2, w3_pad)


def dequantized_weights(packed_params):
    """Effective f32 weights the kernel actually implements (for the reference)."""
    q1, p1, q2, p2, _ = packed_params
    w1_eff = q1.astype(jnp.float32) * p1[3][None, :]
    w2_eff = q2.astype(jnp.float32) * p2[3][None, :]
    return w1_eff, w2_eff


def rh2_reference(x, fp, w1_eff, w2_eff):
    """Pure-JAX reference matching the (repaired) PyTorch forward semantics."""
    def bn(h, g, b):
        m = jnp.mean(h, axis=0, keepdims=True)
        v = jnp.mean((h - m) ** 2, axis=0, keepdims=True)
        return g * (h - m) / jnp.sqrt(v + EPS) + b
    h = jnp.maximum(x @ w1_eff + fp["b1"], 0.0)
    h = bn(h, fp["g1"], fp["beta1"])
    h = jnp.maximum(h @ w2_eff + fp["b2"], 0.0)
    h = bn(h, fp["g2"], fp["beta2"])
    z = h @ fp["w3"] + fp["b3"]
    return jax.nn.sigmoid(z)


if __name__ == "__main__":
    key = jax.random.PRNGKey(0)
    kx, kp = jax.random.split(key)
    B = 8
    x = jax.random.normal(kx, (B, D_IN), jnp.float32)

    fp = init_float_params(kp)
    packed = pack_params(fp)

    out = rh2_forward(x, packed)
    jax.block_until_ready(out)

    assert out.shape == (B, D_OUT)
    assert bool(jnp.all(jnp.isfinite(out)))
    assert bool(jnp.all((out >= 0.0) & (out <= 1.0)))

    # Loose parity check vs a pure-JAX reference built from the same
    # (dequantized) weights; remaining error is the bf16 MXU-operand rounding.
    w1_eff, w2_eff = dequantized_weights(packed)
    ref = rh2_reference(x, fp, w1_eff, w2_eff)
    assert bool(jnp.max(jnp.abs(out - ref)) < 3e-2)

    print("KERNEL_OK")
</pallas_src>

<mosaic_0001>
module attributes {stable_mosaic.version = 11 : i64} {
  func.func @rh2_kernel(%arg0: memref<8x1024xf32, #tpu.memory_space<vmem>>, %arg1: memref<1024x512xi8, #tpu.memory_space<vmem>>, %arg2: memref<4x512xf32, #tpu.memory_space<vmem>>, %arg3: memref<512x128xi8, #tpu.memory_space<vmem>>, %arg4: memref<5x128xf32, #tpu.memory_space<vmem>>, %arg5: memref<128x128xbf16, #tpu.memory_space<vmem>>, %arg6: memref<8x128xf32, #tpu.memory_space<vmem>>) attributes {dimension_semantics = [], scalar_prefetch = 0 : i64, scratch_operands = 0 : i64, tpu.core_type = #tpu.core_type<tc>} {
    %c0 = arith.constant 0 : index
    %c0_0 = arith.constant 0 : index
    %0 = vector.load %arg0[%c0, %c0_0] : memref<8x1024xf32, #tpu.memory_space<vmem>>, vector<8x1024xf32>
    %c0_1 = arith.constant 0 : index
    %c0_2 = arith.constant 0 : index
    %1 = vector.load %arg2[%c0_1, %c0_2] : memref<4x512xf32, #tpu.memory_space<vmem>>, vector<4x512xf32>
    %2 = vector.extract_strided_slice %1 {offsets = [0, 0], sizes = [1, 512], strides = [1, 1]} : vector<4x512xf32> to vector<1x512xf32>
    %3 = vector.extract_strided_slice %1 {offsets = [1, 0], sizes = [1, 512], strides = [1, 1]} : vector<4x512xf32> to vector<1x512xf32>
    %4 = vector.extract_strided_slice %1 {offsets = [2, 0], sizes = [1, 512], strides = [1, 1]} : vector<4x512xf32> to vector<1x512xf32>
    %5 = vector.extract_strided_slice %1 {offsets = [3, 0], sizes = [1, 512], strides = [1, 1]} : vector<4x512xf32> to vector<1x512xf32>
    %c0_3 = arith.constant 0 : index
    %c0_4 = arith.constant 0 : index
    %6 = vector.load %arg4[%c0_3, %c0_4] : memref<5x128xf32, #tpu.memory_space<vmem>>, vector<5x128xf32>
    %7 = vector.extract_strided_slice %6 {offsets = [0, 0], sizes = [1, 128], strides = [1, 1]} : vector<5x128xf32> to vector<1x128xf32>
    %8 = vector.extract_strided_slice %6 {offsets = [1, 0], sizes = [1, 128], strides = [1, 1]} : vector<5x128xf32> to vector<1x128xf32>
    %9 = vector.extract_strided_slice %6 {offsets = [2, 0], sizes = [1, 128], strides = [1, 1]} : vector<5x128xf32> to vector<1x128xf32>
    %10 = vector.extract_strided_slice %6 {offsets = [3, 0], sizes = [1, 128], strides = [1, 1]} : vector<5x128xf32> to vector<1x128xf32>
    %11 = vector.extract_strided_slice %6 {offsets = [4, 0], sizes = [1, 128], strides = [1, 1]} : vector<5x128xf32> to vector<1x128xf32>
    %c0_5 = arith.constant 0 : index
    %c0_6 = arith.constant 0 : index
    %12 = vector.load %arg1[%c0_5, %c0_6] : memref<1024x512xi8, #tpu.memory_space<vmem>>, vector<1024x512xi8>
    %13 = arith.sitofp %12 : vector<1024x512xi8> to vector<1024x512xf32>
    %14 = arith.truncf %13 : vector<1024x512xf32> to vector<1024x512xbf16>
    %15 = arith.truncf %0 : vector<8x1024xf32> to vector<8x1024xbf16>
    %cst = arith.constant dense<0.000000e+00> : vector<8x512xf32>
    %16 = tpu.matmul %15, %14, %cst {dimension_numbers = #tpu.dot_dimension_numbers<[1], [0], [0], [1], [0, 0, 1, 1], [], []>} : vector<8x1024xbf16>, vector<1024x512xbf16>, vector<8x512xf32> -> vector<8x512xf32>
    %17 = vector.broadcast %2 : vector<1x512xf32> to vector<8x512xf32>
    %18 = arith.addf %16, %17 : vector<8x512xf32>
    %cst_7 = arith.constant 0.000000e+00 : f32
    %19 = vector.broadcast %cst_7 : f32 to vector<8x512xf32>
    %20 = arith.maximumf %18, %19 : vector<8x512xf32>
    %cst_8 = arith.constant dense<0.000000e+00> : vector<512xf32>
    %21 = vector.multi_reduction <add>, %20, %cst_8 [0] : vector<8x512xf32> to vector<512xf32>
    %22 = vector.shape_cast %21 : vector<512xf32> to vector<1x512xf32>
    %cst_9 = arith.constant 8.000000e+00 : f32
    %23 = vector.broadcast %cst_9 : f32 to vector<1x512xf32>
    %24 = arith.divf %22, %23 : vector<1x512xf32>
    %25 = vector.broadcast %24 : vector<1x512xf32> to vector<8x512xf32>
    %26 = arith.subf %20, %25 : vector<8x512xf32>
    %27 = arith.mulf %26, %26 : vector<8x512xf32>
    %cst_10 = arith.constant dense<0.000000e+00> : vector<512xf32>
    %28 = vector.multi_reduction <add>, %27, %cst_10 [0] : vector<8x512xf32> to vector<512xf32>
    %29 = vector.shape_cast %28 : vector<512xf32> to vector<1x512xf32>
    %cst_11 = arith.constant 8.000000e+00 : f32
    %30 = vector.broadcast %cst_11 : f32 to vector<1x512xf32>
    %31 = arith.divf %29, %30 : vector<1x512xf32>
    %32 = arith.mulf %3, %5 : vector<1x512xf32>
    %33 = arith.mulf %5, %5 : vector<1x512xf32>
    %34 = arith.mulf %33, %31 : vector<1x512xf32>
    %cst_12 = arith.constant 9.99999974E-6 : f32
    %35 = vector.broadcast %cst_12 : f32 to vector<1x512xf32>
    %36 = arith.addf %34, %35 : vector<1x512xf32>
    %37 = math.rsqrt %36 : vector<1x512xf32>
    %38 = arith.mulf %32, %37 : vector<1x512xf32>
    %39 = arith.mulf %24, %38 : vector<1x512xf32>
    %40 = arith.subf %4, %39 : vector<1x512xf32>
    %41 = vector.broadcast %38 : vector<1x512xf32> to vector<8x512xf32>
    %42 = arith.mulf %20, %41 : vector<8x512xf32>
    %43 = vector.broadcast %40 : vector<1x512xf32> to vector<8x512xf32>
    %44 = arith.addf %42, %43 : vector<8x512xf32>
    %c0_13 = arith.constant 0 : index
    %c0_14 = arith.constant 0 : index
    %45 = vector.load %arg3[%c0_13, %c0_14] : memref<512x128xi8, #tpu.memory_space<vmem>>, vector<512x128xi8>
    %46 = arith.sitofp %45 : vector<512x128xi8> to vector<512x128xf32>
    %47 = arith.truncf %46 : vector<512x128xf32> to vector<512x128xbf16>
    %48 = arith.truncf %44 : vector<8x512xf32> to vector<8x512xbf16>
    %cst_15 = arith.constant dense<0.000000e+00> : vector<8x128xf32>
    %49 = tpu.matmul %48, %47, %cst_15 {dimension_numbers = #tpu.dot_dimension_numbers<[1], [0], [0], [1], [0, 0, 1, 1], [], []>} : vector<8x512xbf16>, vector<512x128xbf16>, vector<8x128xf32> -> vector<8x128xf32>
    %50 = vector.broadcast %7 : vector<1x128xf32> to vector<8x128xf32>
    %51 = arith.addf %49, %50 : vector<8x128xf32>
    %cst_16 = arith.constant 0.000000e+00 : f32
    %52 = vector.broadcast %cst_16 : f32 to vector<8x128xf32>
    %53 = arith.maximumf %51, %52 : vector<8x128xf32>
    %cst_17 = arith.constant dense<0.000000e+00> : vector<128xf32>
    %54 = vector.multi_reduction <add>, %53, %cst_17 [0] : vector<8x128xf32> to vector<128xf32>
    %55 = vector.shape_cast %54 : vector<128xf32> to vector<1x128xf32>
    %cst_18 = arith.constant 8.000000e+00 : f32
    %56 = vector.broadcast %cst_18 : f32 to vector<1x128xf32>
    %57 = arith.divf %55, %56 : vector<1x128xf32>
    %58 = vector.broadcast %57 : vector<1x128xf32> to vector<8x128xf32>
    %59 = arith.subf %53, %58 : vector<8x128xf32>
    %60 = arith.mulf %59, %59 : vector<8x128xf32>
    %cst_19 = arith.constant dense<0.000000e+00> : vector<128xf32>
    %61 = vector.multi_reduction <add>, %60, %cst_19 [0] : vector<8x128xf32> to vector<128xf32>
    %62 = vector.shape_cast %61 : vector<128xf32> to vector<1x128xf32>
    %cst_20 = arith.constant 8.000000e+00 : f32
    %63 = vector.broadcast %cst_20 : f32 to vector<1x128xf32>
    %64 = arith.divf %62, %63 : vector<1x128xf32>
    %65 = arith.mulf %8, %10 : vector<1x128xf32>
    %66 = arith.mulf %10, %10 : vector<1x128xf32>
    %67 = arith.mulf %66, %64 : vector<1x128xf32>
    %cst_21 = arith.constant 9.99999974E-6 : f32
    %68 = vector.broadcast %cst_21 : f32 to vector<1x128xf32>
    %69 = arith.addf %67, %68 : vector<1x128xf32>
    %70 = math.rsqrt %69 : vector<1x128xf32>
    %71 = arith.mulf %65, %70 : vector<1x128xf32>
    %72 = arith.mulf %57, %71 : vector<1x128xf32>
    %73 = arith.subf %9, %72 : vector<1x128xf32>
    %74 = vector.broadcast %71 : vector<1x128xf32> to vector<8x128xf32>
    %75 = arith.mulf %53, %74 : vector<8x128xf32>
    %76 = vector.broadcast %73 : vector<1x128xf32> to vector<8x128xf32>
    %77 = arith.addf %75, %76 : vector<8x128xf32>
    %78 = arith.truncf %77 : vector<8x128xf32> to vector<8x128xbf16>
    %c0_22 = arith.constant 0 : index
    %c0_23 = arith.constant 0 : index
    %79 = vector.load %arg5[%c0_22, %c0_23] : memref<128x128xbf16, #tpu.memory_space<vmem>>, vector<128x128xbf16>
    %cst_24 = arith.constant dense<0.000000e+00> : vector<8x128xf32>
    %80 = tpu.matmul %78, %79, %cst_24 {dimension_numbers = #tpu.dot_dimension_numbers<[1], [0], [0], [1], [0, 0, 1, 1], [], []>} : vector<8x128xbf16>, vector<128x128xbf16>, vector<8x128xf32> -> vector<8x128xf32>
    %81 = vector.broadcast %11 : vector<1x128xf32> to vector<8x128xf32>
    %82 = arith.addf %80, %81 : vector<8x128xf32>
    %cst_25 = arith.constant 5.000000e-01 : f32
    %83 = vector.broadcast %cst_25 : f32 to vector<8x128xf32>
    %84 = arith.mulf %83, %82 : vector<8x128xf32>
    %85 = math.tanh %84 : vector<8x128xf32>
    %cst_26 = arith.constant 1.000000e+00 : f32
    %86 = vector.broadcast %cst_26 : f32 to vector<8x128xf32>
    %87 = arith.addf %85, %86 : vector<8x128xf32>
    %cst_27 = arith.constant 5.000000e-01 : f32
    %88 = vector.broadcast %cst_27 : f32 to vector<8x128xf32>
    %89 = arith.mulf %88, %87 : vector<8x128xf32>
    %c0_28 = arith.constant 0 : index
    %c0_29 = arith.constant 0 : index
    %90 = vector.load %arg6[%c0_28, %c0_29] : memref<8x128xf32, #tpu.memory_space<vmem>>, vector<8x128xf32>
    tpu.vector_store %arg6[%c0_28, %c0_29], %89 {strides = array<i32>} : memref<8x128xf32, #tpu.memory_space<vmem>>, vector<8x128xf32>,
    return
  }
}

</mosaic_0001>

<bundles_post_ra>
// kernel: tpu_custom_call.1
= control target key start
LH: loop header
LB: loop body
LE: loop exit
PB: predicated region body
PF: predicated region fallthrough
CT: control target
= control target key end

     0   :  { %11 = vsyncpa [#allocation3], 0  ;;  %s1879_s0 = inlined_call_operand.hbm [shape: f32[8,1024], index: 0, kind: input, shape index: {}]   ;;  %s1880_s1 = inlined_call_operand.hbm [shape: s8[1024,512], index: 1, kind: input, shape index: {}]   ;;  %s1881_s2 = inlined_call_operand.hbm [shape: f32[4,512], index: 2, kind: input, shape index: {}]   ;;  %s1882_s3 = inlined_call_operand.hbm [shape: s8[512,128], index: 3, kind: input, shape index: {}]   ;;  %s1883_s4 = inlined_call_operand.vmem [shape: f32[5,128], index: 4, kind: input, shape index: {}]   ;;  %s1884_s5 = inlined_call_operand.hbm [shape: bf16[128,128], index: 5, kind: input, shape index: {}]   ;;  %s1885_s6 = inlined_call_operand.hbm [shape: f32[8,128], index: 6, kind: output, shape index: {}]  }
   0x1   :  { %12 = vsyncpa [#allocation6], 0 }
   0x2   :  { %13 = vsyncpa [#allocation9], 0 }
   0x3   :  { %14 = vsyncpa [#allocation4], 0  ;;  %s1657_s21 = smov [#allocation5]   ;;  %s1517_s25 = scalar_lea.hbm %s1880_s1, 16384 }
   0x4   :  { %s30_s22 = sshll.u32 %s1657_s21, 4  ;;  %p1518_p0 = scmp.ne.s32.totalorder %s1880_s1, %s1517_s25  ;;  %s31_s22 = int_to_ptr.vmem [resolvable:$true] %s30_s22 }
   0x5   :  { %p1521_p1 = scmp.lt.u32.totalorder %s1517_s25, %s1880_s1 }
   0x7   :  { %p1523_p2 = pnand %p1521_p1, %p1518_p0 }
   0x9   :  { %1526 = shalt.err (!%p1523_p2)
}
   0xa   :  { %s1527_s30 = scalar_lea.vmem %s31_s22, 16384  ;;  %p1532_p4 = scmp.lt.s32.totalorder %s31_s22, %s31_s22 }
   0xb   :  { %p1528_p3 = scmp.ne.s32.totalorder %s31_s22, %s1527_s30  ;;  %p1533_p5 = scmp.lt.s32.totalorder %s1527_s30, %s1527_s30 }
   0xd   :  { %p1534_p6 = por %p1533_p5, %p1532_p4 }
   0xf   :  { %p1535_p7 = pnand %p1534_p6, %p1528_p3 }
  0x11   :  { %1538 = shalt.err (!%p1535_p7)
}
  0x12   :  { %s1658_s7 = smov 512   ;;  %s1659_s8 = smov 32  }
  0x13   :  { %36 = dma.hbm_to_vmem [thread:$0]  %s1880_s1, 16384, %s31_s22, [#allocation6], %s1658_s7, %s1658_s7, %s1659_s8  }
  0x14   :  { %s1660_s11 = smov [#allocation8]   ;;  %s1539_s15 = scalar_lea.hbm %s1882_s3, 2048 }
  0x15   :  { %s52_s12 = sshll.u32 %s1660_s11, 4  ;;  %p1540_p8 = scmp.ne.s32.totalorder %s1882_s3, %s1539_s15  ;;  %s53_s12 = int_to_ptr.vmem [resolvable:$true] %s52_s12 }
  0x16   :  { %p1543_p9 = scmp.lt.u32.totalorder %s1539_s15, %s1882_s3 }
  0x18   :  { %p1545_p10 = pnand %p1543_p9, %p1540_p8 }
  0x1a   :  { %1548 = shalt.err (!%p1545_p10)
}
  0x1b   :  { %s1549_s20 = scalar_lea.vmem %s53_s12, 2048  ;;  %p1554_p12 = scmp.lt.s32.totalorder %s53_s12, %s53_s12 }
  0x1c   :  { %p1550_p11 = scmp.ne.s32.totalorder %s53_s12, %s1549_s20  ;;  %p1555_p13 = scmp.lt.s32.totalorder %s1549_s20, %s1549_s20 }
  0x1e   :  { %p1556_p0 = por %p1555_p13, %p1554_p12 }
  0x20   :  { %p1557_p1 = pnand %p1556_p0, %p1550_p11 }
  0x22   :  { %1560 = shalt.err (!%p1557_p1)
}
  0x23   :  { %s1661_s1 = smov 128   ;;  %s1662_s21 = smov 8  }
  0x24   :  { %58 = dma.hbm_to_vmem [thread:$0]  %s1882_s3, 2048, %s53_s12, [#allocation9], %s1661_s1, %s1661_s1, %s1662_s21  }
  0x25   :  { %s1663_s24 = smov [#allocation2]   ;;  %s1664_s26 = smov [#allocation7]  }
  0x26   :  { %s21_s25 = sshll.u32 %s1663_s24, 4  ;;  %s43_s27 = sshll.u32 %s1664_s26, 4  ;;  %s22_s25 = int_to_ptr.vmem [resolvable:$true] %s21_s25  ;;  %s44_s27 = int_to_ptr.vmem [resolvable:$true] %s43_s27 }
  0x27   :  { %s1561_s30 = scalar_lea.hbm %s1879_s0, 1024 }
  0x28   :  { %p1562_p2 = scmp.ne.s32.totalorder %s1879_s0, %s1561_s30  ;;  %p1565_p3 = scmp.lt.u32.totalorder %s1561_s30, %s1879_s0 }
  0x2a   :  { %p1567_p4 = pnand %p1565_p3, %p1562_p2 }
  0x2c   :  { %1570 = shalt.err (!%p1567_p4)
}
  0x2d   :  { %s1571_s3 = scalar_lea.vmem %s22_s25, 1024  ;;  %p1576_p6 = scmp.lt.s32.totalorder %s22_s25, %s22_s25 }
  0x2e   :  { %p1572_p5 = scmp.ne.s32.totalorder %s22_s25, %s1571_s3  ;;  %p1577_p7 = scmp.lt.s32.totalorder %s1571_s3, %s1571_s3 }
  0x30   :  { %p1578_p8 = por %p1577_p7, %p1576_p6 }
  0x32   :  { %p1579_p9 = pnand %p1578_p8, %p1572_p5 }
  0x34   :  { %1582 = shalt.err (!%p1579_p9)
}
  0x35   :  { %24 = dma.hbm_to_vmem [thread:$0]  %s1879_s0, 1024, %s22_s25, [#allocation3]  }
  0x36   :  { %s1583_s15 = scalar_lea.hbm %s1881_s2, 256 }
  0x37   :  { %p1584_p10 = scmp.ne.s32.totalorder %s1881_s2, %s1583_s15  ;;  %p1587_p11 = scmp.lt.u32.totalorder %s1583_s15, %s1881_s2 }
  0x39   :  { %p1589_p12 = pnand %p1587_p11, %p1584_p10 }
  0x3b   :  { %1592 = shalt.err (!%p1589_p12)
}
  0x3c   :  { %s1593_s20 = scalar_lea.vmem %s44_s27, 256  ;;  %p1598_p0 = scmp.lt.s32.totalorder %s44_s27, %s44_s27 }
  0x3d   :  { %p1594_p13 = scmp.ne.s32.totalorder %s44_s27, %s1593_s20  ;;  %p1599_p1 = scmp.lt.s32.totalorder %s1593_s20, %s1593_s20 }
  0x3f   :  { %p1600_p2 = por %p1599_p1, %p1598_p0 }
  0x41   :  { %p1601_p3 = pnand %p1600_p2, %p1594_p13 }
  0x43   :  { %1604 = shalt.err (!%p1601_p3)
}
  0x44   :  { %46 = dma.hbm_to_vmem [thread:$0]  %s1881_s2, 256, %s44_s27, [#allocation6]  }
  0x45   :  { %s1665_s21 = smov [#allocation10]   ;;  %s1605_s25 = scalar_lea.hbm %s1884_s5, 1024 }
  0x46   :  { %s66_s22 = sshll.u32 %s1665_s21, 4  ;;  %p1606_p4 = scmp.ne.s32.totalorder %s1884_s5, %s1605_s25  ;;  %s67_s22 = int_to_ptr.vmem [resolvable:$true] %s66_s22 }
  0x47   :  { %p1609_p5 = scmp.lt.u32.totalorder %s1605_s25, %s1884_s5 }
  0x49   :  { %p1611_p6 = pnand %p1609_p5, %p1606_p4 }
  0x4b   :  { %1614 = shalt.err (!%p1611_p6)
}
  0x4c   :  { %s1615_s7 = scalar_lea.vmem %s67_s22, 1024  ;;  %p1620_p8 = scmp.lt.s32.totalorder %s67_s22, %s67_s22 }
  0x4d   :  { %p1616_p7 = scmp.ne.s32.totalorder %s67_s22, %s1615_s7  ;;  %p1621_p9 = scmp.lt.s32.totalorder %s1615_s7, %s1615_s7 }
  0x4f   :  { %p1622_p10 = por %p1621_p9, %p1620_p8 }
  0x51   :  { %p1623_p11 = pnand %p1622_p10, %p1616_p7 }
  0x53   :  { %1626 = shalt.err (!%p1623_p11)
}
  0x54   :  { %s1666_s2 = smov 64   ;;  %s1667_s27 = smov 4  }
  0x55   :  { %72 = dma.hbm_to_vmem [thread:$0]  %s1884_s5, 1024, %s67_s22, [#allocation9], %s1666_s2, %s1666_s2, %s1667_s27  }
  0x56   :  { %1649 = dma.done.wait [#allocation3], 1024  }
  0x57   :  { %1650 = vsyncadd [#allocation3], 4294966272 }
  0x58   :  { %1651 = dma.done.wait [#allocation6], 16640  }
  0x59   :  { %1652 = vsyncadd [#allocation6], 4294950656 }
  0x5a   :  { %1653 = dma.done.wait [#allocation9], 3072  }
  0x5b   :  { %1654 = vsyncadd [#allocation9], 4294964224  ;;  %v101_v0 = vld [vmem:[#allocation5 + $0x8] sm:$0xff]  ;;  %v103_v1 = vld [vmem:[#allocation5 + $0x18] sm:$0xff]  ;;  %vm1669_vm0 = vmmov 0  }
  0x5c   :  { %v100_v2 = vld [vmem:[#allocation5] sm:$0xff]  ;;  %v229_v3 = vunpack.c.l.s8.bf16 %v101_v0  ;;  %v233_v4 = vunpack.c.h.s8.bf16 %v101_v0  ;;  %v231_v5 = vunpack.c.l.s8.bf16 %v103_v1  ;;  %v235_v6 = vunpack.c.h.s8.bf16 %v103_v1  ;;  %v102_v7 = vld [vmem:[#allocation5 + $0x10] sm:$0xff]  ;;  %v105_v10 = vld [vmem:[#allocation5 + $0x28] sm:$0xff] }
  0x5d   :  { %v228_v8 = vunpack.c.l.s8.bf16 %v100_v2  ;;  %v230_v9 = vunpack.c.l.s8.bf16 %v102_v7  ;;  %v107_v11 = vld [vmem:[#allocation5 + $0x38] sm:$0xff]  ;;  %v232_v12 = vunpack.c.h.s8.bf16 %v100_v2  ;;  %v234_v13 = vunpack.c.h.s8.bf16 %v102_v7  ;;  %v104_v16 = vld [vmem:[#allocation5 + $0x20] sm:$0xff]  ;;  %v106_v17 = vld [vmem:[#allocation5 + $0x30] sm:$0xff] }
  0x5e   :  { %530 = vmatprep.subr.bf16.mxu0 %v229_v3  ;;  %694 = vmatprep.subr.bf16.mxu1 %v231_v5  ;;  %v237_v14 = vunpack.c.l.s8.bf16 %v105_v10  ;;  %v239_v15 = vunpack.c.l.s8.bf16 %v107_v11  ;;  %v236_v18 = vunpack.c.l.s8.bf16 %v104_v16  ;;  %v238_v19 = vunpack.c.l.s8.bf16 %v106_v17  ;;  %v109_v22 = vld [vmem:[#allocation5 + $0x48] sm:$0xff]  ;;  %v111_v23 = vld [vmem:[#allocation5 + $0x58] sm:$0xff]  ;;  %v108_v28 = vld [vmem:[#allocation5 + $0x40] sm:$0xff] }
  0x5f   :  { %531 = vmatpush1.bf16.msra.mxu0 %v228_v8  ;;  %695 = vmatpush1.bf16.msra.mxu1 %v230_v9  ;;  %v241_v20 = vunpack.c.h.s8.bf16 %v105_v10  ;;  %v243_v21 = vunpack.c.h.s8.bf16 %v107_v11  ;;  %v240_v24 = vunpack.c.h.s8.bf16 %v104_v16  ;;  %v242_v25 = vunpack.c.h.s8.bf16 %v106_v17  ;;  %v110_v29 = vld [vmem:[#allocation5 + $0x50] sm:$0xff]  ;;  %v90_v30 = vld [vmem:[#allocation2 + $0x8] sm:$0xff]  ;;  %v115_v37 = vld [vmem:[#allocation5 + $0x78] sm:$0xff] }
  0x60   :  { %532 = vmatprep.subr.bf16.mxu0 %v233_v4  ;;  %696 = vmatprep.subr.bf16.mxu1 %v235_v6  ;;  %v245_v26 = vunpack.c.l.s8.bf16 %v109_v22  ;;  %v247_v27 = vunpack.c.l.s8.bf16 %v111_v23  ;;  %v244_v31 = vunpack.c.l.s8.bf16 %v108_v28  ;;  %v246_v32 = vunpack.c.l.s8.bf16 %v110_v29  ;;  %v113_v36 = vld [vmem:[#allocation5 + $0x68] sm:$0xff]  ;;  %v112_v42 = vld [vmem:[#allocation5 + $0x60] sm:$0xff]  ;;  %v114_v43 = vld [vmem:[#allocation5 + $0x70] sm:$0xff] }
  0x61   :  { %v249_v33 = vunpack.c.h.s8.bf16 %v109_v22  ;;  %v251_v34 = vunpack.c.h.s8.bf16 %v111_v23  ;;  %v485_v35 = vpack.c.bf16 %v90_v30, %v90_v30  ;;  %v248_v38 = vunpack.c.h.s8.bf16 %v108_v28  ;;  %v117_v48 = vld [vmem:[#allocation5 + $0x88] sm:$0xff]  ;;  %v119_v49 = vld [vmem:[#allocation5 + $0x98] sm:$0xff]  ;;  %v116_v50 = vld [vmem:[#allocation5 + $0x80] sm:$0xff] }
  0x62   :  { %v250_v39 = vunpack.c.h.s8.bf16 %v110_v29  ;;  %v253_v40 = vunpack.c.l.s8.bf16 %v113_v36  ;;  %v255_v41 = vunpack.c.l.s8.bf16 %v115_v37  ;;  %v252_v44 = vunpack.c.l.s8.bf16 %v112_v42  ;;  %v118_v51 = vld [vmem:[#allocation5 + $0x90] sm:$0xff]  ;;  %v121_v60 = vld [vmem:[#allocation5 + $0xa8] sm:$0xff]  ;;  %v123_v61 = vld [vmem:[#allocation5 + $0xb8] sm:$0xff] }
  0x63   :  { %533 = vmatpush1.bf16.msra.mxu0 %v232_v12  ;;  %697 = vmatpush1.bf16.msra.mxu1 %v234_v13  ;;  %v254_v45 = vunpack.c.l.s8.bf16 %v114_v43  ;;  %v257_v46 = vunpack.c.h.s8.bf16 %v113_v36  ;;  %v259_v47 = vunpack.c.h.s8.bf16 %v115_v37  ;;  %v256_v52 = vunpack.c.h.s8.bf16 %v112_v42  ;;  %v120_v2 = vld [vmem:[#allocation5 + $0xa0] sm:$0xff]  ;;  %v122_v3 = vld [vmem:[#allocation5 + $0xb0] sm:$0xff]  ;;  %v125_v8 = vld [vmem:[#allocation5 + $0xc8] sm:$0xff] }
  0x64   :  { %534 = vmatprep.subr.bf16.mxu0 %v237_v14  ;;  %698 = vmatprep.subr.bf16.mxu1 %v239_v15  ;;  %v258_v53 = vunpack.c.h.s8.bf16 %v114_v43  ;;  %v261_v54 = vunpack.c.l.s8.bf16 %v117_v48  ;;  %v263_v55 = vunpack.c.l.s8.bf16 %v119_v49  ;;  %v260_v56 = vunpack.c.l.s8.bf16 %v116_v50  ;;  %v127_v9 = vld [vmem:[#allocation5 + $0xd8] sm:$0xff]  ;;  %v124_v14 = vld [vmem:[#allocation5 + $0xc0] sm:$0xff]  ;;  %v126_v15 = vld [vmem:[#allocation5 + $0xd0] sm:$0xff] }
  0x65   :  { %562 = vmatprep.mubr.bf16.mxu0 %v485_v35  ;;  %726 = vmatprep.mubr.bf16.mxu1 %v485_v35  ;;  %v262_v57 = vunpack.c.l.s8.bf16 %v118_v51  ;;  %v265_v58 = vunpack.c.h.s8.bf16 %v117_v48  ;;  %v267_v59 = vunpack.c.h.s8.bf16 %v119_v49  ;;  %v264_v62 = vunpack.c.h.s8.bf16 %v116_v50  ;;  %v89_v36 = vld [vmem:[#allocation2] sm:$0xff]  ;;  %v92_v42 = vld [vmem:[#allocation2 + $0x18] sm:$0xff] }
  0x66   :  { %v266_v63 = vunpack.c.h.s8.bf16 %v118_v51  ;;  %v269_v0 = vunpack.c.l.s8.bf16 %v121_v60  ;;  %v271_v1 = vunpack.c.l.s8.bf16 %v123_v61  ;;  %v268_v4 = vunpack.c.l.s8.bf16 %v120_v2  ;;  %v139_v48 = vld [vmem:[#allocation5 + $0x138] sm:$0xff] }
  0x67   :  { %535 = vmatpush1.bf16.msra.mxu0 %v236_v18  ;;  %699 = vmatpush1.bf16.msra.mxu1 %v238_v19  ;;  %v270_v5 = vunpack.c.l.s8.bf16 %v122_v3  ;;  %v273_v6 = vunpack.c.h.s8.bf16 %v121_v60  ;;  %v275_v7 = vunpack.c.h.s8.bf16 %v123_v61  ;;  %v272_v10 = vunpack.c.h.s8.bf16 %v120_v2  ;;  %v141_v60 = vld [vmem:[#allocation5 + $0x148] sm:$0xff]  ;;  %v143_v61 = vld [vmem:[#allocation5 + $0x158] sm:$0xff]  ;;  %v140_v2 = vld [vmem:[#allocation5 + $0x140] sm:$0xff] }
  0x68   :  { %536 = vmatprep.subr.bf16.mxu0 %v241_v20  ;;  %700 = vmatprep.subr.bf16.mxu1 %v243_v21  ;;  %v274_v11 = vunpack.c.h.s8.bf16 %v122_v3  ;;  %v277_v12 = vunpack.c.l.s8.bf16 %v125_v8  ;;  %v279_v13 = vunpack.c.l.s8.bf16 %v127_v9  ;;  %v276_v16 = vunpack.c.l.s8.bf16 %v124_v14  ;;  %v129_v20 = vld [vmem:[#allocation5 + $0xe8] sm:$0xff]  ;;  %v131_v21 = vld [vmem:[#allocation5 + $0xf8] sm:$0xff]  ;;  %v142_v3 = vld [vmem:[#allocation5 + $0x150] sm:$0xff] }
  0x69   :  { %v278_v17 = vunpack.c.l.s8.bf16 %v126_v15  ;;  %v281_v18 = vunpack.c.h.s8.bf16 %v125_v8  ;;  %v283_v19 = vunpack.c.h.s8.bf16 %v127_v9  ;;  %v280_v22 = vunpack.c.h.s8.bf16 %v124_v14  ;;  %v145_v8 = vld [vmem:[#allocation5 + $0x168] sm:$0xff]  ;;  %v147_v9 = vld [vmem:[#allocation5 + $0x178] sm:$0xff]  ;;  %v144_v14 = vld [vmem:[#allocation5 + $0x160] sm:$0xff] }
  0x6a   :  { %v282_v23 = vunpack.c.h.s8.bf16 %v126_v15  ;;  %v289_v30 = vunpack.c.h.s8.bf16 %v129_v20  ;;  %v487_v49 = vpack.c.bf16 %v92_v42, %v92_v42  ;;  %v146_v15 = vld [vmem:[#allocation5 + $0x170] sm:$0xff] }
  0x6b   :  { %537 = vmatpush1.bf16.msra.mxu0 %v240_v24  ;;  %701 = vmatpush1.bf16.msra.mxu1 %v242_v25  ;;  %v285_v24 = vunpack.c.l.s8.bf16 %v129_v20  ;;  %v287_v25 = vunpack.c.l.s8.bf16 %v131_v21  ;;  %v149_v20 = vld [vmem:[#allocation5 + $0x188] sm:$0xff] }
  0x6c   :  { %538 = vmatprep.subr.bf16.mxu0 %v245_v26  ;;  %702 = vmatprep.subr.bf16.mxu1 %v247_v27  ;;  %v128_v26 = vld [vmem:[#allocation5 + $0xe0] sm:$0xff]  ;;  %v130_v27 = vld [vmem:[#allocation5 + $0xf0] sm:$0xff] }
  0x6d   :  { %v284_v28 = vunpack.c.l.s8.bf16 %v128_v26  ;;  %v286_v29 = vunpack.c.l.s8.bf16 %v130_v27  ;;  %v290_v35 = vunpack.c.h.s8.bf16 %v130_v27  ;;  %v150_v27 = vld [vmem:[#allocation5 + $0x190] sm:$0xff] }
  0x6f   :  { %539 = vmatpush1.bf16.msra.mxu0 %v244_v31  ;;  %703 = vmatpush1.bf16.msra.mxu1 %v246_v32  ;;  %v291_v31 = vunpack.c.h.s8.bf16 %v131_v21  ;;  %v133_v32 = vld [vmem:[#allocation5 + $0x108] sm:$0xff]  ;;  %v151_v21 = vld [vmem:[#allocation5 + $0x198] sm:$0xff] }
  0x70   :  { %540 = vmatprep.subr.bf16.mxu0 %v249_v33  ;;  %704 = vmatprep.subr.bf16.mxu1 %v251_v34  ;;  %v135_v33 = vld [vmem:[#allocation5 + $0x118] sm:$0xff]  ;;  %v288_v34 = vunpack.c.h.s8.bf16 %v128_v26  ;;  %v293_v37 = vunpack.c.l.s8.bf16 %v133_v32  ;;  %v148_v26 = vld [vmem:[#allocation5 + $0x180] sm:$0xff] }
  0x73   :  { %541 = vmatpush1.bf16.msra.mxu0 %v248_v38  ;;  %705 = vmatpush1.bf16.msra.mxu1 %v250_v39  ;;  %v295_v38 = vunpack.c.l.s8.bf16 %v135_v33  ;;  %v132_v39 = vld [vmem:[#allocation5 + $0x100] sm:$0xff] }
  0x74   :  { %542 = vmatprep.subr.bf16.mxu0 %v253_v40  ;;  %706 = vmatprep.subr.bf16.mxu1 %v255_v41  ;;  %v134_v40 = vld [vmem:[#allocation5 + $0x110] sm:$0xff]  ;;  %v484_v41 = vpack.c.bf16 %v89_v36, %v89_v36  ;;  %v292_v43 = vunpack.c.l.s8.bf16 %v132_v39  ;;  %v296_v50 = vunpack.c.h.s8.bf16 %v132_v39 }
  0x75   :  { %v298_v51 = vunpack.c.h.s8.bf16 %v134_v40  ;;  %v154_v39 = vld [vmem:[#allocation5 + $0x1b0] sm:$0xff] }
  0x77   :  { %543 = vmatpush1.bf16.msra.mxu0 %v252_v44  ;;  %707 = vmatpush1.bf16.msra.mxu1 %v254_v45  ;;  %v294_v44 = vunpack.c.l.s8.bf16 %v134_v40  ;;  %v297_v45 = vunpack.c.h.s8.bf16 %v133_v32  ;;  %v153_v32 = vld [vmem:[#allocation5 + $0x1a8] sm:$0xff] }
  0x78   :  { %544 = vmatprep.subr.bf16.mxu0 %v257_v46  ;;  %708 = vmatprep.subr.bf16.mxu1 %v259_v47  ;;  %v299_v46 = vunpack.c.h.s8.bf16 %v135_v33  ;;  %v137_v47 = vld [vmem:[#allocation5 + $0x128] sm:$0xff]  ;;  %v155_v33 = vld [vmem:[#allocation5 + $0x1b8] sm:$0xff]  ;;  %v333_v36 = vunpack.c.l.s8.bf16 %v153_v32  ;;  %v337_v42 = vunpack.c.h.s8.bf16 %v153_v32 }
  0x79   :  { %v173_v32 = vld [vmem:[#allocation5 + $0x248] sm:$0xff] }
  0x7b   :  { %545 = vmatpush1.bf16.msra.mxu0 %v256_v52  ;;  %709 = vmatpush1.bf16.msra.mxu1 %v258_v53  ;;  %v301_v52 = vunpack.c.l.s8.bf16 %v137_v47  ;;  %v303_v53 = vunpack.c.l.s8.bf16 %v139_v48 }
  0x7c   :  { %546 = vmatprep.subr.bf16.mxu0 %v261_v54  ;;  %710 = vmatprep.subr.bf16.mxu1 %v263_v55  ;;  %v136_v54 = vld [vmem:[#allocation5 + $0x120] sm:$0xff]  ;;  %v138_v55 = vld [vmem:[#allocation5 + $0x130] sm:$0xff] }
  0x7f   :  { %547 = vmatpush1.bf16.msra.mxu0 %v260_v56  ;;  %711 = vmatpush1.bf16.msra.mxu1 %v262_v57  ;;  %v300_v56 = vunpack.c.l.s8.bf16 %v136_v54  ;;  %v302_v57 = vunpack.c.l.s8.bf16 %v138_v55 }
  0x80   :  { %548 = vmatprep.subr.bf16.mxu0 %v265_v58  ;;  %712 = vmatprep.subr.bf16.mxu1 %v267_v59  ;;  %v305_v58 = vunpack.c.h.s8.bf16 %v137_v47  ;;  %v307_v59 = vunpack.c.h.s8.bf16 %v139_v48  ;;  %v338_v47 = vunpack.c.h.s8.bf16 %v154_v39 }
  0x83   :  { %549 = vmatpush1.bf16.msra.mxu0 %v264_v62  ;;  %713 = vmatpush1.bf16.msra.mxu1 %v266_v63  ;;  %v304_v62 = vunpack.c.h.s8.bf16 %v136_v54  ;;  %v306_v63 = vunpack.c.h.s8.bf16 %v138_v55 }
  0x84   :  { %550 = vmatprep.subr.bf16.mxu0 %v269_v0  ;;  %714 = vmatprep.subr.bf16.mxu1 %v271_v1  ;;  %v309_v0 = vunpack.c.l.s8.bf16 %v141_v60  ;;  %v311_v1 = vunpack.c.l.s8.bf16 %v143_v61 }
  0x87   :  { %551 = vmatpush1.bf16.msra.mxu0 %v268_v4  ;;  %715 = vmatpush1.bf16.msra.mxu1 %v270_v5  ;;  %v308_v4 = vunpack.c.l.s8.bf16 %v140_v2  ;;  %v310_v5 = vunpack.c.l.s8.bf16 %v142_v3 }
  0x88   :  { %552 = vmatprep.subr.bf16.mxu0 %v273_v6  ;;  %716 = vmatprep.subr.bf16.mxu1 %v275_v7  ;;  %v313_v6 = vunpack.c.h.s8.bf16 %v141_v60  ;;  %v315_v7 = vunpack.c.h.s8.bf16 %v143_v61 }
  0x8b   :  { %553 = vmatpush1.bf16.msra.mxu0 %v272_v10  ;;  %717 = vmatpush1.bf16.msra.mxu1 %v274_v11  ;;  %v312_v10 = vunpack.c.h.s8.bf16 %v140_v2  ;;  %v314_v11 = vunpack.c.h.s8.bf16 %v142_v3 }
  0x8c   :  { %554 = vmatprep.subr.bf16.mxu0 %v277_v12  ;;  %718 = vmatprep.subr.bf16.mxu1 %v279_v13  ;;  %v317_v12 = vunpack.c.l.s8.bf16 %v145_v8  ;;  %v319_v13 = vunpack.c.l.s8.bf16 %v147_v9 }
  0x8f   :  { %555 = vmatpush1.bf16.msra.mxu0 %v276_v16  ;;  %719 = vmatpush1.bf16.msra.mxu1 %v278_v17  ;;  %v316_v16 = vunpack.c.l.s8.bf16 %v144_v14  ;;  %v318_v17 = vunpack.c.l.s8.bf16 %v146_v15 }
  0x90   :  { %556 = vmatprep.subr.bf16.mxu0 %v281_v18  ;;  %720 = vmatprep.subr.bf16.mxu1 %v283_v19  ;;  %v321_v18 = vunpack.c.h.s8.bf16 %v145_v8  ;;  %v323_v19 = vunpack.c.h.s8.bf16 %v147_v9  ;;  %v91_v8 = vld [vmem:[#allocation2 + $0x10] sm:$0xff] }
  0x93   :  { %557 = vmatpush1.bf16.msra.mxu0 %v280_v22  ;;  %721 = vmatpush1.bf16.msra.mxu1 %v282_v23  ;;  %v320_v22 = vunpack.c.h.s8.bf16 %v144_v14  ;;  %v322_v23 = vunpack.c.h.s8.bf16 %v146_v15  ;;  %v94_v14 = vld [vmem:[#allocation2 + $0x28] sm:$0xff] }
  0x94   :  { %558 = vmatprep.subr.bf16.mxu0 %v285_v24  ;;  %722 = vmatprep.subr.bf16.mxu1 %v287_v25  ;;  %v325_v24 = vunpack.c.l.s8.bf16 %v149_v20  ;;  %v327_v25 = vunpack.c.l.s8.bf16 %v151_v21 }
  0x97   :  { %559 = vmatpush1.bf16.msra.mxu0 %v284_v28  ;;  %723 = vmatpush1.bf16.msra.mxu1 %v286_v29  ;;  %v324_v28 = vunpack.c.l.s8.bf16 %v148_v26  ;;  %v326_v29 = vunpack.c.l.s8.bf16 %v150_v27 }
  0x98   :  { %560 = vmatprep.subr.bf16.mxu0 %v289_v30  ;;  %724 = vmatprep.subr.bf16.mxu1 %v291_v31  ;;  %v329_v30 = vunpack.c.h.s8.bf16 %v149_v20  ;;  %v331_v31 = vunpack.c.h.s8.bf16 %v151_v21  ;;  %v171_v20 = vld [vmem:[#allocation5 + $0x238] sm:$0xff]  ;;  %v489_v21 = vpack.c.bf16 %v94_v14, %v94_v14 }
  0x9b   :  { %561 = vmatpush1.bf16.msra.mxu0 %v288_v34  ;;  %725 = vmatpush1.bf16.msra.mxu1 %v290_v35  ;;  %v328_v34 = vunpack.c.h.s8.bf16 %v148_v26  ;;  %v330_v35 = vunpack.c.h.s8.bf16 %v150_v27  ;;  %v168_v26 = vld [vmem:[#allocation5 + $0x220] sm:$0xff]  ;;  %v170_v27 = vld [vmem:[#allocation5 + $0x230] sm:$0xff] }
  0x9c   :  { %571 = vmatprep.subr.bf16.mxu0 %v293_v37  ;;  %735 = vmatprep.subr.bf16.mxu1 %v295_v38  ;;  %v335_v37 = vunpack.c.l.s8.bf16 %v155_v33  ;;  %v152_v38 = vld [vmem:[#allocation5 + $0x1a0] sm:$0xff] }
  0x9d   :  { %v332_v40 = vunpack.c.l.s8.bf16 %v152_v38 }
  0x9e   :  { %563 = vmatmul.mubr.bf16.vlgmr.msra.gmra.mrb[0].mxu0 %v484_v41  ;;  %727 = vmatmul.mubr.bf16.vlgmr.msra.gmra.mrb[0].mxu1 %v484_v41  ;;  %v334_v41 = vunpack.c.l.s8.bf16 %v154_v39  ;;  %v174_v39 = vld [vmem:[#allocation5 + $0x250] sm:$0xff] }
  0x9f   :  { %572 = vmatpush1.bf16.msra.mxu0 %v292_v43  ;;  %736 = vmatpush1.bf16.msra.mxu1 %v294_v44  ;;  %v339_v43 = vunpack.c.h.s8.bf16 %v155_v33  ;;  %v157_v44 = vld [vmem:[#allocation5 + $0x1c8] sm:$0xff]  ;;  %v175_v33 = vld [vmem:[#allocation5 + $0x258] sm:$0xff] }
  0xa0   :  { %573 = vmatprep.subr.bf16.mxu0 %v297_v45  ;;  %737 = vmatprep.subr.bf16.mxu1 %v299_v46  ;;  %v159_v45 = vld [vmem:[#allocation5 + $0x1d8] sm:$0xff]  ;;  %v336_v46 = vunpack.c.h.s8.bf16 %v152_v38  ;;  %v341_v48 = vunpack.c.l.s8.bf16 %v157_v44  ;;  %v345_v54 = vunpack.c.h.s8.bf16 %v157_v44  ;;  %v172_v38 = vld [vmem:[#allocation5 + $0x240] sm:$0xff]  ;;  %v177_v44 = vld [vmem:[#allocation5 + $0x268] sm:$0xff] }
  0xa1   :  { %603 = vmatprep.mubr.bf16.mxu0 %v487_v49  ;;  %767 = vmatprep.mubr.bf16.mxu1 %v487_v49  ;;  %v343_v49 = vunpack.c.l.s8.bf16 %v159_v45  ;;  %v347_v55 = vunpack.c.h.s8.bf16 %v159_v45  ;;  %v179_v45 = vld [vmem:[#allocation5 + $0x278] sm:$0xff] }
  0xa3   :  { %574 = vmatpush1.bf16.msra.mxu0 %v296_v50  ;;  %738 = vmatpush1.bf16.msra.mxu1 %v298_v51  ;;  %v156_v50 = vld [vmem:[#allocation5 + $0x1c0] sm:$0xff]  ;;  %v158_v51 = vld [vmem:[#allocation5 + $0x1d0] sm:$0xff] }
  0xa4   :  { %575 = vmatprep.subr.bf16.mxu0 %v301_v52  ;;  %739 = vmatprep.subr.bf16.mxu1 %v303_v53  ;;  %v340_v52 = vunpack.c.l.s8.bf16 %v156_v50  ;;  %v342_v53 = vunpack.c.l.s8.bf16 %v158_v51 }
  0xa7   :  { %576 = vmatpush1.bf16.msra.mxu0 %v300_v56  ;;  %740 = vmatpush1.bf16.msra.mxu1 %v302_v57  ;;  %v161_v56 = vld [vmem:[#allocation5 + $0x1e8] sm:$0xff]  ;;  %v163_v57 = vld [vmem:[#allocation5 + $0x1f8] sm:$0xff] }
  0xa8   :  { %577 = vmatprep.subr.bf16.mxu0 %v305_v58  ;;  %741 = vmatprep.subr.bf16.mxu1 %v307_v59  ;;  %v344_v58 = vunpack.c.h.s8.bf16 %v156_v50  ;;  %v346_v59 = vunpack.c.h.s8.bf16 %v158_v51  ;;  %v349_v60 = vunpack.c.l.s8.bf16 %v161_v56  ;;  %v351_v61 = vunpack.c.l.s8.bf16 %v163_v57  ;;  %v176_v50 = vld [vmem:[#allocation5 + $0x260] sm:$0xff]  ;;  %v178_v51 = vld [vmem:[#allocation5 + $0x270] sm:$0xff] }
  0xa9   :  { %v353_v2 = vunpack.c.h.s8.bf16 %v161_v56  ;;  %v355_v3 = vunpack.c.h.s8.bf16 %v163_v57  ;;  %v181_v56 = vld [vmem:[#allocation5 + $0x288] sm:$0xff]  ;;  %v183_v57 = vld [vmem:[#allocation5 + $0x298] sm:$0xff] }
  0xab   :  { %578 = vmatpush1.bf16.msra.mxu0 %v304_v62  ;;  %742 = vmatpush1.bf16.msra.mxu1 %v306_v63  ;;  %v160_v62 = vld [vmem:[#allocation5 + $0x1e0] sm:$0xff]  ;;  %v162_v63 = vld [vmem:[#allocation5 + $0x1f0] sm:$0xff] }
  0xac   :  { %579 = vmatprep.subr.bf16.mxu0 %v309_v0  ;;  %743 = vmatprep.subr.bf16.mxu1 %v311_v1  ;;  %v348_v0 = vunpack.c.l.s8.bf16 %v160_v62  ;;  %v350_v1 = vunpack.c.l.s8.bf16 %v162_v63 }
  0xaf   :  { %580 = vmatpush1.bf16.msra.mxu0 %v308_v4  ;;  %744 = vmatpush1.bf16.msra.mxu1 %v310_v5  ;;  %v165_v4 = vld [vmem:[#allocation5 + $0x208] sm:$0xff]  ;;  %v167_v5 = vld [vmem:[#allocation5 + $0x218] sm:$0xff] }
  0xb0   :  { %581 = vmatprep.subr.bf16.mxu0 %v313_v6  ;;  %745 = vmatprep.subr.bf16.mxu1 %v315_v7  ;;  %v352_v6 = vunpack.c.h.s8.bf16 %v160_v62  ;;  %v354_v7 = vunpack.c.h.s8.bf16 %v162_v63  ;;  %v357_v9 = vunpack.c.l.s8.bf16 %v165_v4  ;;  %v180_v62 = vld [vmem:[#allocation5 + $0x280] sm:$0xff]  ;;  %v182_v63 = vld [vmem:[#allocation5 + $0x290] sm:$0xff] }
  0xb3   :  { %582 = vmatpush1.bf16.msra.mxu0 %v312_v10  ;;  %746 = vmatpush1.bf16.msra.mxu1 %v314_v11  ;;  %v359_v10 = vunpack.c.l.s8.bf16 %v167_v5  ;;  %v164_v11 = vld [vmem:[#allocation5 + $0x200] sm:$0xff] }
  0xb4   :  { %583 = vmatprep.subr.bf16.mxu0 %v317_v12  ;;  %747 = vmatprep.subr.bf16.mxu1 %v319_v13  ;;  %v166_v12 = vld [vmem:[#allocation5 + $0x210] sm:$0xff]  ;;  %v486_v13 = vpack.c.bf16 %v91_v8, %v91_v8  ;;  %v356_v15 = vunpack.c.l.s8.bf16 %v164_v11 }
  0xb7   :  { %584 = vmatpush1.bf16.msra.mxu0 %v316_v16  ;;  %748 = vmatpush1.bf16.msra.mxu1 %v318_v17  ;;  %v358_v16 = vunpack.c.l.s8.bf16 %v166_v12  ;;  %v361_v17 = vunpack.c.h.s8.bf16 %v165_v4  ;;  %v185_v4 = vld [vmem:[#allocation5 + $0x2a8] sm:$0xff] }
  0xb8   :  { %585 = vmatprep.subr.bf16.mxu0 %v321_v18  ;;  %749 = vmatprep.subr.bf16.mxu1 %v323_v19  ;;  %v363_v18 = vunpack.c.h.s8.bf16 %v167_v5  ;;  %v169_v19 = vld [vmem:[#allocation5 + $0x228] sm:$0xff]  ;;  %v187_v5 = vld [vmem:[#allocation5 + $0x2b8] sm:$0xff]  ;;  %v397_v8 = vunpack.c.l.s8.bf16 %v185_v4  ;;  %v401_v14 = vunpack.c.h.s8.bf16 %v185_v4 }
  0xb9   :  { %v205_v4 = vld [vmem:[#allocation5 + $0x348] sm:$0xff] }
  0xbb   :  { %586 = vmatpush1.bf16.msra.mxu0 %v320_v22  ;;  %750 = vmatpush1.bf16.msra.mxu1 %v322_v23  ;;  %v360_v22 = vunpack.c.h.s8.bf16 %v164_v11  ;;  %v362_v23 = vunpack.c.h.s8.bf16 %v166_v12  ;;  %v186_v11 = vld [vmem:[#allocation5 + $0x2b0] sm:$0xff] }
  0xbc   :  { %587 = vmatprep.subr.bf16.mxu0 %v325_v24  ;;  %751 = vmatprep.subr.bf16.mxu1 %v327_v25  ;;  %v365_v24 = vunpack.c.l.s8.bf16 %v169_v19  ;;  %v367_v25 = vunpack.c.l.s8.bf16 %v171_v20 }
  0xbf   :  { %588 = vmatpush1.bf16.msra.mxu0 %v324_v28  ;;  %752 = vmatpush1.bf16.msra.mxu1 %v326_v29  ;;  %v364_v28 = vunpack.c.l.s8.bf16 %v168_v26  ;;  %v366_v29 = vunpack.c.l.s8.bf16 %v170_v27 }
  0xc0   :  { %589 = vmatprep.subr.bf16.mxu0 %v329_v30  ;;  %753 = vmatprep.subr.bf16.mxu1 %v331_v31  ;;  %v369_v30 = vunpack.c.h.s8.bf16 %v169_v19  ;;  %v371_v31 = vunpack.c.h.s8.bf16 %v171_v20  ;;  %v402_v19 = vunpack.c.h.s8.bf16 %v186_v11 }
  0xc3   :  { %590 = vmatpush1.bf16.msra.mxu0 %v328_v34  ;;  %754 = vmatpush1.bf16.msra.mxu1 %v330_v35  ;;  %v368_v34 = vunpack.c.h.s8.bf16 %v168_v26  ;;  %v370_v35 = vunpack.c.h.s8.bf16 %v170_v27 }
  0xc4   :  { %591 = vmatprep.subr.bf16.mxu0 %v333_v36  ;;  %755 = vmatprep.subr.bf16.mxu1 %v335_v37  ;;  %v373_v36 = vunpack.c.l.s8.bf16 %v173_v32  ;;  %v375_v37 = vunpack.c.l.s8.bf16 %v175_v33 }
  0xc7   :  { %592 = vmatpush1.bf16.msra.mxu0 %v332_v40  ;;  %756 = vmatpush1.bf16.msra.mxu1 %v334_v41  ;;  %v372_v40 = vunpack.c.l.s8.bf16 %v172_v38  ;;  %v374_v41 = vunpack.c.l.s8.bf16 %v174_v39 }
  0xc8   :  { %593 = vmatprep.subr.bf16.mxu0 %v337_v42  ;;  %757 = vmatprep.subr.bf16.mxu1 %v339_v43  ;;  %v377_v42 = vunpack.c.h.s8.bf16 %v173_v32  ;;  %v379_v43 = vunpack.c.h.s8.bf16 %v175_v33 }
  0xcb   :  { %594 = vmatpush1.bf16.msra.mxu0 %v336_v46  ;;  %758 = vmatpush1.bf16.msra.mxu1 %v338_v47  ;;  %v376_v46 = vunpack.c.h.s8.bf16 %v172_v38  ;;  %v378_v47 = vunpack.c.h.s8.bf16 %v174_v39 }
  0xcc   :  { %595 = vmatprep.subr.bf16.mxu0 %v341_v48  ;;  %759 = vmatprep.subr.bf16.mxu1 %v343_v49  ;;  %v381_v48 = vunpack.c.l.s8.bf16 %v177_v44  ;;  %v383_v49 = vunpack.c.l.s8.bf16 %v179_v45 }
  0xcf   :  { %596 = vmatpush1.bf16.msra.mxu0 %v340_v52  ;;  %760 = vmatpush1.bf16.msra.mxu1 %v342_v53  ;;  %v380_v52 = vunpack.c.l.s8.bf16 %v176_v50  ;;  %v382_v53 = vunpack.c.l.s8.bf16 %v178_v51 }
  0xd0   :  { %597 = vmatprep.subr.bf16.mxu0 %v345_v54  ;;  %761 = vmatprep.subr.bf16.mxu1 %v347_v55  ;;  %v385_v54 = vunpack.c.h.s8.bf16 %v177_v44  ;;  %v387_v55 = vunpack.c.h.s8.bf16 %v179_v45  ;;  %v93_v44 = vld [vmem:[#allocation2 + $0x20] sm:$0xff] }
  0xd3   :  { %598 = vmatpush1.bf16.msra.mxu0 %v344_v58  ;;  %762 = vmatpush1.bf16.msra.mxu1 %v346_v59  ;;  %v384_v58 = vunpack.c.h.s8.bf16 %v176_v50  ;;  %v386_v59 = vunpack.c.h.s8.bf16 %v178_v51  ;;  %v96_v50 = vld [vmem:[#allocation2 + $0x38] sm:$0xff] }
  0xd4   :  { %599 = vmatprep.subr.bf16.mxu0 %v349_v60  ;;  %763 = vmatprep.subr.bf16.mxu1 %v351_v61  ;;  %v389_v60 = vunpack.c.l.s8.bf16 %v181_v56  ;;  %v391_v61 = vunpack.c.l.s8.bf16 %v183_v57 }
  0xd7   :  { %600 = vmatpush1.bf16.msra.mxu0 %v348_v0  ;;  %764 = vmatpush1.bf16.msra.mxu1 %v350_v1  ;;  %v388_v0 = vunpack.c.l.s8.bf16 %v180_v62  ;;  %v390_v1 = vunpack.c.l.s8.bf16 %v182_v63 }
  0xd8   :  { %601 = vmatprep.subr.bf16.mxu0 %v353_v2  ;;  %765 = vmatprep.subr.bf16.mxu1 %v355_v3  ;;  %v393_v2 = vunpack.c.h.s8.bf16 %v181_v56  ;;  %v395_v3 = vunpack.c.h.s8.bf16 %v183_v57  ;;  %v203_v56 = vld [vmem:[#allocation5 + $0x338] sm:$0xff]  ;;  %v491_v57 = vpack.c.bf16 %v96_v50, %v96_v50 }
  0xdb   :  { %602 = vmatpush1.bf16.msra.mxu0 %v352_v6  ;;  %766 = vmatpush1.bf16.msra.mxu1 %v354_v7  ;;  %v392_v6 = vunpack.c.h.s8.bf16 %v180_v62  ;;  %v394_v7 = vunpack.c.h.s8.bf16 %v182_v63  ;;  %v200_v62 = vld [vmem:[#allocation5 + $0x320] sm:$0xff]  ;;  %v202_v63 = vld [vmem:[#allocation5 + $0x330] sm:$0xff] }
  0xdc   :  { %612 = vmatprep.subr.bf16.mxu0 %v357_v9  ;;  %776 = vmatprep.subr.bf16.mxu1 %v359_v10  ;;  %v399_v9 = vunpack.c.l.s8.bf16 %v187_v5  ;;  %v184_v10 = vld [vmem:[#allocation5 + $0x2a0] sm:$0xff] }
  0xdd   :  { %v396_v12 = vunpack.c.l.s8.bf16 %v184_v10 }
  0xde   :  { %604 = vmatmul.mubr.bf16.vlgmr.msra.gmra.mrb[0].mxu0 %v486_v13  ;;  %768 = vmatmul.mubr.bf16.vlgmr.msra.gmra.mrb[0].mxu1 %v486_v13  ;;  %v398_v13 = vunpack.c.l.s8.bf16 %v186_v11  ;;  %v206_v11 = vld [vmem:[#allocation5 + $0x350] sm:$0xff] }
  0xdf   :  { %613 = vmatpush1.bf16.msra.mxu0 %v356_v15  ;;  %777 = vmatpush1.bf16.msra.mxu1 %v358_v16  ;;  %v403_v15 = vunpack.c.h.s8.bf16 %v187_v5  ;;  %v189_v16 = vld [vmem:[#allocation5 + $0x2c8] sm:$0xff]  ;;  %v207_v5 = vld [vmem:[#allocation5 + $0x358] sm:$0xff] }
  0xe0   :  { %614 = vmatprep.subr.bf16.mxu0 %v361_v17  ;;  %778 = vmatprep.subr.bf16.mxu1 %v363_v18  ;;  %v191_v17 = vld [vmem:[#allocation5 + $0x2d8] sm:$0xff]  ;;  %v400_v18 = vunpack.c.h.s8.bf16 %v184_v10  ;;  %v405_v20 = vunpack.c.l.s8.bf16 %v189_v16  ;;  %v409_v26 = vunpack.c.h.s8.bf16 %v189_v16  ;;  %v204_v10 = vld [vmem:[#allocation5 + $0x340] sm:$0xff]  ;;  %v209_v16 = vld [vmem:[#allocation5 + $0x368] sm:$0xff] }
  0xe1   :  { %644 = vmatprep.mubr.bf16.mxu0 %v489_v21  ;;  %808 = vmatprep.mubr.bf16.mxu1 %v489_v21  ;;  %v407_v21 = vunpack.c.l.s8.bf16 %v191_v17  ;;  %v411_v27 = vunpack.c.h.s8.bf16 %v191_v17  ;;  %v211_v17 = vld [vmem:[#allocation5 + $0x378] sm:$0xff] }
  0xe3   :  { %615 = vmatpush1.bf16.msra.mxu0 %v360_v22  ;;  %779 = vmatpush1.bf16.msra.mxu1 %v362_v23  ;;  %v188_v22 = vld [vmem:[#allocation5 + $0x2c0] sm:$0xff]  ;;  %v190_v23 = vld [vmem:[#allocation5 + $0x2d0] sm:$0xff] }
  0xe4   :  { %616 = vmatprep.subr.bf16.mxu0 %v365_v24  ;;  %780 = vmatprep.subr.bf16.mxu1 %v367_v25  ;;  %v404_v24 = vunpack.c.l.s8.bf16 %v188_v22  ;;  %v406_v25 = vunpack.c.l.s8.bf16 %v190_v23 }
  0xe7   :  { %617 = vmatpush1.bf16.msra.mxu0 %v364_v28  ;;  %781 = vmatpush1.bf16.msra.mxu1 %v366_v29  ;;  %v193_v28 = vld [vmem:[#allocation5 + $0x2e8] sm:$0xff]  ;;  %v195_v29 = vld [vmem:[#allocation5 + $0x2f8] sm:$0xff] }
  0xe8   :  { %618 = vmatprep.subr.bf16.mxu0 %v369_v30  ;;  %782 = vmatprep.subr.bf16.mxu1 %v371_v31  ;;  %v408_v30 = vunpack.c.h.s8.bf16 %v188_v22  ;;  %v410_v31 = vunpack.c.h.s8.bf16 %v190_v23  ;;  %v413_v32 = vunpack.c.l.s8.bf16 %v193_v28  ;;  %v415_v33 = vunpack.c.l.s8.bf16 %v195_v29  ;;  %v208_v22 = vld [vmem:[#allocation5 + $0x360] sm:$0xff]  ;;  %v210_v23 = vld [vmem:[#allocation5 + $0x370] sm:$0xff] }
  0xe9   :  { %v417_v38 = vunpack.c.h.s8.bf16 %v193_v28  ;;  %v419_v39 = vunpack.c.h.s8.bf16 %v195_v29  ;;  %v213_v28 = vld [vmem:[#allocation5 + $0x388] sm:$0xff]  ;;  %v215_v29 = vld [vmem:[#allocation5 + $0x398] sm:$0xff] }
  0xeb   :  { %619 = vmatpush1.bf16.msra.mxu0 %v368_v34  ;;  %783 = vmatpush1.bf16.msra.mxu1 %v370_v35  ;;  %v192_v34 = vld [vmem:[#allocation5 + $0x2e0] sm:$0xff]  ;;  %v194_v35 = vld [vmem:[#allocation5 + $0x2f0] sm:$0xff] }
  0xec   :  { %620 = vmatprep.subr.bf16.mxu0 %v373_v36  ;;  %784 = vmatprep.subr.bf16.mxu1 %v375_v37  ;;  %v412_v36 = vunpack.c.l.s8.bf16 %v192_v34  ;;  %v414_v37 = vunpack.c.l.s8.bf16 %v194_v35 }
  0xef   :  { %621 = vmatpush1.bf16.msra.mxu0 %v372_v40  ;;  %785 = vmatpush1.bf16.msra.mxu1 %v374_v41  ;;  %v197_v40 = vld [vmem:[#allocation5 + $0x308] sm:$0xff]  ;;  %v199_v41 = vld [vmem:[#allocation5 + $0x318] sm:$0xff] }
  0xf0   :  { %622 = vmatprep.subr.bf16.mxu0 %v377_v42  ;;  %786 = vmatprep.subr.bf16.mxu1 %v379_v43  ;;  %v416_v42 = vunpack.c.h.s8.bf16 %v192_v34  ;;  %v418_v43 = vunpack.c.h.s8.bf16 %v194_v35  ;;  %v421_v45 = vunpack.c.l.s8.bf16 %v197_v40  ;;  %v212_v34 = vld [vmem:[#allocation5 + $0x380] sm:$0xff]  ;;  %v214_v35 = vld [vmem:[#allocation5 + $0x390] sm:$0xff] }
  0xf3   :  { %623 = vmatpush1.bf16.msra.mxu0 %v376_v46  ;;  %787 = vmatpush1.bf16.msra.mxu1 %v378_v47  ;;  %v423_v46 = vunpack.c.l.s8.bf16 %v199_v41  ;;  %v196_v47 = vld [vmem:[#allocation5 + $0x300] sm:$0xff] }
  0xf4   :  { %624 = vmatprep.subr.bf16.mxu0 %v381_v48  ;;  %788 = vmatprep.subr.bf16.mxu1 %v383_v49  ;;  %v198_v48 = vld [vmem:[#allocation5 + $0x310] sm:$0xff]  ;;  %v488_v49 = vpack.c.bf16 %v93_v44, %v93_v44  ;;  %v420_v51 = vunpack.c.l.s8.bf16 %v196_v47 }
  0xf7   :  { %625 = vmatpush1.bf16.msra.mxu0 %v380_v52  ;;  %789 = vmatpush1.bf16.msra.mxu1 %v382_v53  ;;  %v422_v52 = vunpack.c.l.s8.bf16 %v198_v48  ;;  %v425_v53 = vunpack.c.h.s8.bf16 %v197_v40  ;;  %v217_v40 = vld [vmem:[#allocation5 + $0x3a8] sm:$0xff] }
  0xf8   :  { %626 = vmatprep.subr.bf16.mxu0 %v385_v54  ;;  %790 = vmatprep.subr.bf16.mxu1 %v387_v55  ;;  %v427_v54 = vunpack.c.h.s8.bf16 %v199_v41  ;;  %v201_v55 = vld [vmem:[#allocation5 + $0x328] sm:$0xff]  ;;  %v219_v41 = vld [vmem:[#allocation5 + $0x3b8] sm:$0xff]  ;;  %v461_v44 = vunpack.c.l.s8.bf16 %v217_v40  ;;  %v465_v50 = vunpack.c.h.s8.bf16 %v217_v40 }
  0xfb   :  { %627 = vmatpush1.bf16.msra.mxu0 %v384_v58  ;;  %791 = vmatpush1.bf16.msra.mxu1 %v386_v59  ;;  %v424_v58 = vunpack.c.h.s8.bf16 %v196_v47  ;;  %v426_v59 = vunpack.c.h.s8.bf16 %v198_v48  ;;  %v218_v47 = vld [vmem:[#allocation5 + $0x3b0] sm:$0xff] }
  0xfc   :  { %628 = vmatprep.subr.bf16.mxu0 %v389_v60  ;;  %792 = vmatprep.subr.bf16.mxu1 %v391_v61  ;;  %v429_v60 = vunpack.c.l.s8.bf16 %v201_v55  ;;  %v431_v61 = vunpack.c.l.s8.bf16 %v203_v56 }
  0xff   :  { %629 = vmatpush1.bf16.msra.mxu0 %v388_v0  ;;  %793 = vmatpush1.bf16.msra.mxu1 %v390_v1  ;;  %v428_v0 = vunpack.c.l.s8.bf16 %v200_v62  ;;  %v430_v1 = vunpack.c.l.s8.bf16 %v202_v63 }
 0x100   :  { %630 = vmatprep.subr.bf16.mxu0 %v393_v2  ;;  %794 = vmatprep.subr.bf16.mxu1 %v395_v3  ;;  %v433_v2 = vunpack.c.h.s8.bf16 %v201_v55  ;;  %v435_v3 = vunpack.c.h.s8.bf16 %v203_v56  ;;  %v466_v55 = vunpack.c.h.s8.bf16 %v218_v47 }
 0x103   :  { %631 = vmatpush1.bf16.msra.mxu0 %v392_v6  ;;  %795 = vmatpush1.bf16.msra.mxu1 %v394_v7  ;;  %v432_v6 = vunpack.c.h.s8.bf16 %v200_v62  ;;  %v434_v7 = vunpack.c.h.s8.bf16 %v202_v63 }
 0x104   :  { %632 = vmatprep.subr.bf16.mxu0 %v397_v8  ;;  %796 = vmatprep.subr.bf16.mxu1 %v399_v9  ;;  %v437_v8 = vunpack.c.l.s8.bf16 %v205_v4  ;;  %v439_v9 = vunpack.c.l.s8.bf16 %v207_v5 }
 0x107   :  { %633 = vmatpush1.bf16.msra.mxu0 %v396_v12  ;;  %797 = vmatpush1.bf16.msra.mxu1 %v398_v13  ;;  %v436_v12 = vunpack.c.l.s8.bf16 %v204_v10  ;;  %v438_v13 = vunpack.c.l.s8.bf16 %v206_v11 }
 0x108   :  { %634 = vmatprep.subr.bf16.mxu0 %v401_v14  ;;  %798 = vmatprep.subr.bf16.mxu1 %v403_v15  ;;  %v441_v14 = vunpack.c.h.s8.bf16 %v205_v4  ;;  %v443_v15 = vunpack.c.h.s8.bf16 %v207_v5 }
 0x10b   :  { %635 = vmatpush1.bf16.msra.mxu0 %v400_v18  ;;  %799 = vmatpush1.bf16.msra.mxu1 %v402_v19  ;;  %v440_v18 = vunpack.c.h.s8.bf16 %v204_v10  ;;  %v442_v19 = vunpack.c.h.s8.bf16 %v206_v11 }
 0x10c   :  { %636 = vmatprep.subr.bf16.mxu0 %v405_v20  ;;  %800 = vmatprep.subr.bf16.mxu1 %v407_v21  ;;  %v445_v20 = vunpack.c.l.s8.bf16 %v209_v16  ;;  %v447_v21 = vunpack.c.l.s8.bf16 %v211_v17 }
 0x10f   :  { %637 = vmatpush1.bf16.msra.mxu0 %v404_v24  ;;  %801 = vmatpush1.bf16.msra.mxu1 %v406_v25  ;;  %v444_v24 = vunpack.c.l.s8.bf16 %v208_v22  ;;  %v446_v25 = vunpack.c.l.s8.bf16 %v210_v23 }
 0x110   :  { %638 = vmatprep.subr.bf16.mxu0 %v409_v26  ;;  %802 = vmatprep.subr.bf16.mxu1 %v411_v27  ;;  %v449_v26 = vunpack.c.h.s8.bf16 %v209_v16  ;;  %v451_v27 = vunpack.c.h.s8.bf16 %v211_v17  ;;  %v1067_v16 = vld [vmem:[#allocation8 + $0x20] sm:$0xff] }
 0x111   :  { %v1075_v17 = vld [vmem:[#allocation8 + $0x60] sm:$0xff] }
 0x113   :  { %639 = vmatpush1.bf16.msra.mxu0 %v408_v30  ;;  %803 = vmatpush1.bf16.msra.mxu1 %v410_v31  ;;  %v448_v30 = vunpack.c.h.s8.bf16 %v208_v22  ;;  %v450_v31 = vunpack.c.h.s8.bf16 %v210_v23  ;;  %v1071_v22 = vld [vmem:[#allocation8 + $0x40] sm:$0xff]  ;;  %v1088_v23 = vunpack.c.h.s8.bf16 %v1067_v16 }
 0x114   :  { %640 = vmatprep.subr.bf16.mxu0 %v413_v32  ;;  %804 = vmatprep.subr.bf16.mxu1 %v415_v33  ;;  %v453_v32 = vunpack.c.l.s8.bf16 %v213_v28  ;;  %v455_v33 = vunpack.c.l.s8.bf16 %v215_v29 }
 0x117   :  { %641 = vmatpush1.bf16.msra.mxu0 %v412_v36  ;;  %805 = vmatpush1.bf16.msra.mxu1 %v414_v37  ;;  %v452_v36 = vunpack.c.l.s8.bf16 %v212_v34  ;;  %v454_v37 = vunpack.c.l.s8.bf16 %v214_v35 }
 0x118   :  { %642 = vmatprep.subr.bf16.mxu0 %v417_v38  ;;  %806 = vmatprep.subr.bf16.mxu1 %v419_v39  ;;  %v457_v38 = vunpack.c.h.s8.bf16 %v213_v28  ;;  %v459_v39 = vunpack.c.h.s8.bf16 %v215_v29  ;;  %v1096_v29 = vunpack.c.h.s8.bf16 %v1071_v22 }
 0x11b   :  { %643 = vmatpush1.bf16.msra.mxu0 %v416_v42  ;;  %807 = vmatpush1.bf16.msra.mxu1 %v418_v43  ;;  %v456_v42 = vunpack.c.h.s8.bf16 %v212_v34  ;;  %v458_v43 = vunpack.c.h.s8.bf16 %v214_v35 }
 0x11c   :  { %653 = vmatprep.subr.bf16.mxu0 %v421_v45  ;;  %817 = vmatprep.subr.bf16.mxu1 %v423_v46  ;;  %v463_v45 = vunpack.c.l.s8.bf16 %v219_v41  ;;  %v216_v46 = vld [vmem:[#allocation5 + $0x3a0] sm:$0xff] }
 0x11d   :  { %v460_v48 = vunpack.c.l.s8.bf16 %v216_v46 }
 0x11e   :  { %645 = vmatmul.mubr.bf16.vlgmr.msra.gmra.mrb[0].mxu0 %v488_v49  ;;  %809 = vmatmul.mubr.bf16.vlgmr.msra.gmra.mrb[0].mxu1 %v488_v49  ;;  %v462_v49 = vunpack.c.l.s8.bf16 %v218_v47 }
 0x11f   :  { %654 = vmatpush1.bf16.msra.mxu0 %v420_v51  ;;  %818 = vmatpush1.bf16.msra.mxu1 %v422_v52  ;;  %v467_v51 = vunpack.c.h.s8.bf16 %v219_v41  ;;  %v221_v52 = vld [vmem:[#allocation5 + $0x3c8] sm:$0xff] }
 0x120   :  { %655 = vmatprep.subr.bf16.mxu0 %v425_v53  ;;  %819 = vmatprep.subr.bf16.mxu1 %v427_v54  ;;  %v223_v53 = vld [vmem:[#allocation5 + $0x3d8] sm:$0xff]  ;;  %v464_v54 = vunpack.c.h.s8.bf16 %v216_v46  ;;  %v469_v56 = vunpack.c.l.s8.bf16 %v221_v52  ;;  %v473_v62 = vunpack.c.h.s8.bf16 %v221_v52 }
 0x121   :  { %685 = vmatprep.mubr.bf16.mxu0 %v491_v57  ;;  %849 = vmatprep.mubr.bf16.mxu1 %v491_v57  ;;  %v471_v57 = vunpack.c.l.s8.bf16 %v223_v53  ;;  %v475_v63 = vunpack.c.h.s8.bf16 %v223_v53 }
 0x123   :  { %656 = vmatpush1.bf16.msra.mxu0 %v424_v58  ;;  %820 = vmatpush1.bf16.msra.mxu1 %v426_v59  ;;  %v220_v58 = vld [vmem:[#allocation5 + $0x3c0] sm:$0xff]  ;;  %v222_v59 = vld [vmem:[#allocation5 + $0x3d0] sm:$0xff] }
 0x124   :  { %657 = vmatprep.subr.bf16.mxu0 %v429_v60  ;;  %821 = vmatprep.subr.bf16.mxu1 %v431_v61  ;;  %v468_v60 = vunpack.c.l.s8.bf16 %v220_v58  ;;  %v470_v61 = vunpack.c.l.s8.bf16 %v222_v59 }
 0x127   :  { %658 = vmatpush1.bf16.msra.mxu0 %v428_v0  ;;  %822 = vmatpush1.bf16.msra.mxu1 %v430_v1  ;;  %v225_v0 = vld [vmem:[#allocation5 + $0x3e8] sm:$0xff]  ;;  %v227_v1 = vld [vmem:[#allocation5 + $0x3f8] sm:$0xff] }
 0x128   :  { %659 = vmatprep.subr.bf16.mxu0 %v433_v2  ;;  %823 = vmatprep.subr.bf16.mxu1 %v435_v3  ;;  %v472_v2 = vunpack.c.h.s8.bf16 %v220_v58  ;;  %v474_v3 = vunpack.c.h.s8.bf16 %v222_v59  ;;  %v477_v4 = vunpack.c.l.s8.bf16 %v225_v0  ;;  %v479_v5 = vunpack.c.l.s8.bf16 %v227_v1 }
 0x129   :  { %v481_v10 = vunpack.c.h.s8.bf16 %v225_v0  ;;  %v483_v11 = vunpack.c.h.s8.bf16 %v227_v1  ;;  %v494_v0 = vlaneseq }
 0x12b   :  { %660 = vmatpush1.bf16.msra.mxu0 %v432_v6  ;;  %824 = vmatpush1.bf16.msra.mxu1 %v434_v7  ;;  %v224_v6 = vld [vmem:[#allocation5 + $0x3e0] sm:$0xff]  ;;  %v226_v7 = vld [vmem:[#allocation5 + $0x3f0] sm:$0xff]  ;;  %v1766_v1 = vshrl.u32 %v494_v0, 7 }
 0x12c   :  { %661 = vmatprep.subr.bf16.mxu0 %v437_v8  ;;  %825 = vmatprep.subr.bf16.mxu1 %v439_v9  ;;  %v476_v8 = vunpack.c.l.s8.bf16 %v224_v6  ;;  %v478_v9 = vunpack.c.l.s8.bf16 %v226_v7 }
 0x12f   :  { %662 = vmatpush1.bf16.msra.mxu0 %v436_v12  ;;  %826 = vmatpush1.bf16.msra.mxu1 %v438_v13  ;;  %v480_v12 = vunpack.c.h.s8.bf16 %v224_v6  ;;  %v482_v13 = vunpack.c.h.s8.bf16 %v226_v7 }
 0x130   :  { %663 = vmatprep.subr.bf16.mxu0 %v441_v14  ;;  %827 = vmatprep.subr.bf16.mxu1 %v443_v15  ;;  %v95_v14 = vld [vmem:[#allocation2 + $0x30] sm:$0xff] }
 0x131   :  { %v490_v15 = vpack.c.bf16 %v95_v14, %v95_v14 }
 0x133   :  { %664 = vmatpush1.bf16.msra.mxu0 %v440_v18  ;;  %828 = vmatpush1.bf16.msra.mxu1 %v442_v19  ;;  %v1063_v18 = vld [vmem:[#allocation8] sm:$0xff]  ;;  %v1087_v19 = vunpack.c.l.s8.bf16 %v1067_v16 }
 0x134   :  { %665 = vmatprep.subr.bf16.mxu0 %v445_v20  ;;  %829 = vmatprep.subr.bf16.mxu1 %v447_v21  ;;  %v1103_v20 = vunpack.c.l.s8.bf16 %v1075_v17  ;;  %v1079_v21 = vunpack.c.l.s8.bf16 %v1063_v18  ;;  %v1080_v28 = vunpack.c.h.s8.bf16 %v1063_v18 }
 0x137   :  { %666 = vmatpush1.bf16.msra.mxu0 %v444_v24  ;;  %830 = vmatpush1.bf16.msra.mxu1 %v446_v25  ;;  %v1095_v24 = vunpack.c.l.s8.bf16 %v1071_v22  ;;  %v1104_v25 = vunpack.c.h.s8.bf16 %v1075_v17 }
 0x138   :  { %667 = vmatprep.subr.bf16.mxu0 %v449_v26  ;;  %831 = vmatprep.subr.bf16.mxu1 %v451_v27  ;;  %v1068_v26 = vld [vmem:[#allocation8 + $0x28] sm:$0xff] }
 0x139   :  { %v1076_v27 = vld [vmem:[#allocation8 + $0x68] sm:$0xff] }
 0x13b   :  { %668 = vmatpush1.bf16.msra.mxu0 %v448_v30  ;;  %832 = vmatpush1.bf16.msra.mxu1 %v450_v31  ;;  %v1089_v30 = vunpack.c.l.s8.bf16 %v1068_v26  ;;  %v1105_v31 = vunpack.c.l.s8.bf16 %v1076_v27 }
 0x13c   :  { %669 = vmatprep.subr.bf16.mxu0 %v453_v32  ;;  %833 = vmatprep.subr.bf16.mxu1 %v455_v33  ;;  %v1064_v32 = vld [vmem:[#allocation8 + $0x8] sm:$0xff] }
 0x13d   :  { %v1072_v33 = vld [vmem:[#allocation8 + $0x48] sm:$0xff]  ;;  %v1081_v34 = vunpack.c.l.s8.bf16 %v1064_v32  ;;  %v1082_v40 = vunpack.c.h.s8.bf16 %v1064_v32 }
 0x13e   :  { %v1097_v35 = vunpack.c.l.s8.bf16 %v1072_v33  ;;  %v1098_v41 = vunpack.c.h.s8.bf16 %v1072_v33 }
 0x13f   :  { %670 = vmatpush1.bf16.msra.mxu0 %v452_v36  ;;  %834 = vmatpush1.bf16.msra.mxu1 %v454_v37  ;;  %v1090_v36 = vunpack.c.h.s8.bf16 %v1068_v26  ;;  %v1106_v37 = vunpack.c.h.s8.bf16 %v1076_v27 }
 0x140   :  { %671 = vmatprep.subr.bf16.mxu0 %v457_v38  ;;  %835 = vmatprep.subr.bf16.mxu1 %v459_v39  ;;  %v1069_v38 = vld [vmem:[#allocation8 + $0x30] sm:$0xff] }
 0x141   :  { %v1077_v39 = vld [vmem:[#allocation8 + $0x70] sm:$0xff] }
 0x143   :  { %672 = vmatpush1.bf16.msra.mxu0 %v456_v42  ;;  %836 = vmatpush1.bf16.msra.mxu1 %v458_v43  ;;  %v1091_v42 = vunpack.c.l.s8.bf16 %v1069_v38  ;;  %v1107_v43 = vunpack.c.l.s8.bf16 %v1077_v39 }
 0x144   :  { %673 = vmatprep.subr.bf16.mxu0 %v461_v44  ;;  %837 = vmatprep.subr.bf16.mxu1 %v463_v45  ;;  %v1065_v44 = vld [vmem:[#allocation8 + $0x10] sm:$0xff] }
 0x145   :  { %v1073_v45 = vld [vmem:[#allocation8 + $0x50] sm:$0xff]  ;;  %v1083_v46 = vunpack.c.l.s8.bf16 %v1065_v44  ;;  %v1084_v52 = vunpack.c.h.s8.bf16 %v1065_v44 }
 0x146   :  { %v1099_v47 = vunpack.c.l.s8.bf16 %v1073_v45  ;;  %v1100_v53 = vunpack.c.h.s8.bf16 %v1073_v45 }
 0x147   :  { %674 = vmatpush1.bf16.msra.mxu0 %v460_v48  ;;  %838 = vmatpush1.bf16.msra.mxu1 %v462_v49  ;;  %v1092_v48 = vunpack.c.h.s8.bf16 %v1069_v38  ;;  %v1108_v49 = vunpack.c.h.s8.bf16 %v1077_v39 }
 0x148   :  { %675 = vmatprep.subr.bf16.mxu0 %v465_v50  ;;  %839 = vmatprep.subr.bf16.mxu1 %v467_v51  ;;  %v1070_v50 = vld [vmem:[#allocation8 + $0x38] sm:$0xff] }
 0x149   :  { %v1078_v51 = vld [vmem:[#allocation8 + $0x78] sm:$0xff] }
 0x14b   :  { %676 = vmatpush1.bf16.msra.mxu0 %v464_v54  ;;  %840 = vmatpush1.bf16.msra.mxu1 %v466_v55  ;;  %v1093_v54 = vunpack.c.l.s8.bf16 %v1070_v50  ;;  %v1109_v55 = vunpack.c.l.s8.bf16 %v1078_v51 }
 0x14c   :  { %677 = vmatprep.subr.bf16.mxu0 %v469_v56  ;;  %841 = vmatprep.subr.bf16.mxu1 %v471_v57  ;;  %v1066_v56 = vld [vmem:[#allocation8 + $0x18] sm:$0xff] }
 0x14d   :  { %v1074_v57 = vld [vmem:[#allocation8 + $0x58] sm:$0xff]  ;;  %v1085_v58 = vunpack.c.l.s8.bf16 %v1066_v56 }
 0x14e   :  { %v1101_v59 = vunpack.c.l.s8.bf16 %v1074_v57 }
 0x14f   :  { %678 = vmatpush1.bf16.msra.mxu0 %v468_v60  ;;  %842 = vmatpush1.bf16.msra.mxu1 %v470_v61  ;;  %v1094_v60 = vunpack.c.h.s8.bf16 %v1070_v50  ;;  %v1110_v61 = vunpack.c.h.s8.bf16 %v1078_v51 }
 0x150   :  { %679 = vmatprep.subr.bf16.mxu0 %v473_v62  ;;  %843 = vmatprep.subr.bf16.mxu1 %v475_v63  ;;  %v1086_v62 = vunpack.c.h.s8.bf16 %v1066_v56  ;;  %v1102_v63 = vunpack.c.h.s8.bf16 %v1074_v57 }
 0x153   :  { %680 = vmatpush1.bf16.msra.mxu0 %v472_v2  ;;  %844 = vmatpush1.bf16.msra.mxu1 %v474_v3  ;;  %v1769_v2 = vsub.s32 0, %v1766_v1  ;;  %v1771_v3 = vld [vmem:[#allocation7] sm:$0xff] }
 0x154   :  { %681 = vmatprep.subr.bf16.mxu0 %v477_v4  ;;  %845 = vmatprep.subr.bf16.mxu1 %v479_v5  ;;  %v1773_v4 = vld [vmem:[#allocation7 + $0x8] sm:$0xff]  ;;  %v1776_v5 = vsub.s32 4, %v1766_v1 }
 0x155   :  { %v497_v6 = vrot.slane %v1771_v3, %v1769_v2  ;;  %v505_v7 = vrot.slane %v1773_v4, %v1769_v2 }
 0x157   :  { %682 = vmatpush1.bf16.msra.mxu0 %v476_v8  ;;  %846 = vmatpush1.bf16.msra.mxu1 %v478_v9  ;;  %v501_v8 = vrot.slane %v1771_v3, %v1776_v5  ;;  %v509_v9 = vrot.slane %v1773_v4, %v1776_v5 }
 0x158   :  { %683 = vmatprep.subr.bf16.mxu0 %v481_v10  ;;  %847 = vmatprep.subr.bf16.mxu1 %v483_v11  ;;  %v517_v10 = vrot.slane %v497_v6, %v1769_v2  ;;  %v525_v11 = vrot.slane %v505_v7, %v1769_v2 }
 0x15b   :  { %684 = vmatpush1.bf16.msra.mxu0 %v480_v12  ;;  %848 = vmatpush1.bf16.msra.mxu1 %v482_v13  ;;  %v521_v12 = vrot.slane %v501_v8, %v1769_v2  ;;  %v529_v13 = vrot.slane %v509_v9, %v1769_v2 }
 0x15c   :  { %1386 = vmatprep.subr.bf16.mxu0 %v1087_v19  ;;  %1408 = vmatprep.subr.bf16.mxu1 %v1103_v20 }
 0x15e   :  { %686 = vmatmul.mubr.bf16.vlgmr.msra.gmra.mrb[0].mxu0 %v490_v15  ;;  %850 = vmatmul.mubr.bf16.vlgmr.msra.gmra.mrb[0].mxu1 %v490_v15 }
 0x15f   :  { %1387 = vmatpush3.bf16.msra.mxu0 %v1079_v21  ;;  %1409 = vmatpush3.bf16.msra.mxu1 %v1095_v24 }
 0x160   :  { %1388 = vmatprep.subr.bf16.mxu0 %v1088_v23  ;;  %1410 = vmatprep.subr.bf16.mxu1 %v1104_v25 }
 0x163   :  { %1389 = vmatpush3.bf16.msra.mxu0 %v1080_v28  ;;  %1411 = vmatpush3.bf16.msra.mxu1 %v1096_v29 }
 0x164   :  { %1390 = vmatprep.subr.bf16.mxu0 %v1089_v30  ;;  %1412 = vmatprep.subr.bf16.mxu1 %v1105_v31 }
 0x167   :  { %1391 = vmatpush3.bf16.msra.mxu0 %v1081_v34  ;;  %1413 = vmatpush3.bf16.msra.mxu1 %v1097_v35 }
 0x168   :  { %1392 = vmatprep.subr.bf16.mxu0 %v1090_v36  ;;  %1414 = vmatprep.subr.bf16.mxu1 %v1106_v37 }
 0x16b   :  { %1393 = vmatpush3.bf16.msra.mxu0 %v1082_v40  ;;  %1415 = vmatpush3.bf16.msra.mxu1 %v1098_v41 }
 0x16c   :  { %1394 = vmatprep.subr.bf16.mxu0 %v1091_v42  ;;  %1416 = vmatprep.subr.bf16.mxu1 %v1107_v43 }
 0x16f   :  { %1395 = vmatpush3.bf16.msra.mxu0 %v1083_v46  ;;  %1417 = vmatpush3.bf16.msra.mxu1 %v1099_v47 }
 0x170   :  { %1396 = vmatprep.subr.bf16.mxu0 %v1092_v48  ;;  %1418 = vmatprep.subr.bf16.mxu1 %v1108_v49 }
 0x173   :  { %1397 = vmatpush3.bf16.msra.mxu0 %v1084_v52  ;;  %1419 = vmatpush3.bf16.msra.mxu1 %v1100_v53 }
 0x174   :  { %1398 = vmatprep.subr.bf16.mxu0 %v1093_v54  ;;  %1420 = vmatprep.subr.bf16.mxu1 %v1109_v55 }
 0x177   :  { %1399 = vmatpush3.bf16.msra.mxu0 %v1085_v58  ;;  %1421 = vmatpush3.bf16.msra.mxu1 %v1101_v59 }
 0x178   :  { %1400 = vmatprep.subr.bf16.mxu0 %v1094_v60  ;;  %1422 = vmatprep.subr.bf16.mxu1 %v1110_v61 }
 0x17b   :  { %1401 = vmatpush3.bf16.msra.mxu0 %v1086_v62  ;;  %1423 = vmatpush3.bf16.msra.mxu1 %v1102_v63 }
 0x231   :  { %v687_v14 = vpop.f32.mrb[0].mxu0  ;;  %v851_v15 = vpop.f32.mrb[0].mxu1 }
 0x232   :  { %v1459_v16 = vadd.f32 %v687_v14, %v517_v10  ;;  %v1461_v17 = vadd.f32 %v851_v15, %v525_v11  ;;  %v689_v18 = vpop.f32.mrb[1].mxu0  ;;  %v853_v19 = vpop.f32.mrb[1].mxu1 }
 0x233   :  { %v1460_v20 = vadd.f32 %v689_v18, %v521_v12  ;;  %v1462_v21 = vadd.f32 %v853_v19, %v529_v13  ;;  %v691_v22 = vpop.f32.mrb[2].mxu0  ;;  %v855_v23 = vpop.f32.mrb[2].mxu1 }
 0x234   :  { %v1790_v24 = vmax.f32 %v1459_v16, 0.0  ;;  %v1792_v25 = vmax.f32 %v1461_v17, 0.0  ;;  %v692_v26 = vpop.f32.mrb[3].mxu0  ;;  %v856_v27 = vpop.f32.mrb[3].mxu1 }
 0x235   :  { %v1794_v28 = vmax.f32 %v1460_v20, 0.0  ;;  %v1796_v29 = vmax.f32 %v1462_v21, 0.0 }
 0x236   :  { %v862_v30 = vrot.slane %v1790_v24, 4  ;;  %v874_v31 = vrot.slane %v1792_v25, 4 }
 0x237   :  { %v868_v32 = vrot.slane %v1794_v28, 4  ;;  %v880_v33 = vrot.slane %v1796_v29, 4 }
 0x238   :  { %v863_v34 = vadd.f32 %v862_v30, %v1790_v24  ;;  %v875_v35 = vadd.f32 %v874_v31, %v1792_v25 }
 0x239   :  { %v869_v36 = vadd.f32 %v868_v32, %v1794_v28  ;;  %v881_v37 = vadd.f32 %v880_v33, %v1796_v29 }
 0x23a   :  { %v864_v38 = vrot.slane %v863_v34, 2  ;;  %v876_v39 = vrot.slane %v875_v35, 2 }
 0x23b   :  { %v870_v40 = vrot.slane %v869_v36, 2  ;;  %v882_v41 = vrot.slane %v881_v37, 2 }
 0x23c   :  { %v865_v42 = vadd.f32 %v864_v38, %v863_v34  ;;  %v877_v43 = vadd.f32 %v876_v39, %v875_v35 }
 0x23d   :  { %v871_v44 = vadd.f32 %v870_v40, %v869_v36  ;;  %v883_v45 = vadd.f32 %v882_v41, %v881_v37  ;;  %v935_v41 = vmul.f32 %v1771_v3, %v1771_v3 }
 0x23e   :  { %v866_v46 = vrot.slane %v865_v42, 1  ;;  %v878_v47 = vrot.slane %v877_v43, 1 }
 0x23f   :  { %v872_v48 = vrot.slane %v871_v44, 1  ;;  %v884_v49 = vrot.slane %v883_v45, 1 }
 0x240   :  { %v867_v50 = vadd.f32 %v866_v46, %v865_v42  ;;  %v879_v51 = vadd.f32 %v878_v47, %v877_v43  ;;  %v936_v42 = vmul.f32 %v1773_v4, %v1773_v4 }
 0x241   :  { %v873_v52 = vadd.f32 %v872_v48, %v871_v44  ;;  %v885_v53 = vadd.f32 %v884_v49, %v883_v45  ;;  %v1374_v49 = vrot.slane %v1771_v3, 10 }
 0x242   :  { %v1806_v54 = vmul.f32 0.125, %v867_v50  ;;  %v1808_v55 = vmul.f32 0.125, %v879_v51  ;;  %v1375_v50 = vrot.slane %v1773_v4, 10 }
 0x243   :  { %v1810_v56 = vmul.f32 0.125, %v873_v52  ;;  %v1812_v57 = vmul.f32 0.125, %v885_v53  ;;  %v933_v51 = vmul.f32 %v1374_v49, %v1771_v3 }
 0x244   :  { %v891_v58 = vsub.f32 %v1790_v24, %v1806_v54  ;;  %v893_v59 = vsub.f32 %v1792_v25, %v1808_v55  ;;  %v934_v53 = vmul.f32 %v1375_v50, %v1773_v4 }
 0x245   :  { %v892_v60 = vsub.f32 %v1794_v28, %v1810_v56  ;;  %v894_v61 = vsub.f32 %v1796_v29, %v1812_v57 }
 0x246   :  { %v895_v62 = vmul.f32 %v891_v58, %v891_v58  ;;  %v897_v63 = vmul.f32 %v893_v59, %v893_v59 }
 0x247   :  { %v896_v0 = vmul.f32 %v892_v60, %v892_v60  ;;  %v898_v6 = vmul.f32 %v894_v61, %v894_v61  ;;  %v1831_v60 = vsub.s32 1, %v1766_v1  ;;  %v971_v61 = vsub.s32 5, %v1766_v1 }
 0x248   :  { %v899_v7 = vrot.slane %v895_v62, 4  ;;  %v911_v8 = vrot.slane %v897_v63, 4 }
 0x249   :  { %v905_v9 = vrot.slane %v896_v0, 4  ;;  %v917_v10 = vrot.slane %v898_v6, 4 }
 0x24a   :  { %v900_v11 = vadd.f32 %v899_v7, %v895_v62  ;;  %v912_v12 = vadd.f32 %v911_v8, %v897_v63 }
 0x24b   :  { %v906_v13 = vadd.f32 %v905_v9, %v896_v0  ;;  %v918_v14 = vadd.f32 %v917_v10, %v898_v6 }
 0x24c   :  { %v901_v15 = vrot.slane %v900_v11, 2  ;;  %v913_v16 = vrot.slane %v912_v12, 2 }
 0x24d   :  { %v907_v17 = vrot.slane %v906_v13, 2  ;;  %v919_v18 = vrot.slane %v918_v14, 2 }
 0x24e   :  { %v902_v19 = vadd.f32 %v901_v15, %v900_v11  ;;  %v914_v20 = vadd.f32 %v913_v16, %v912_v12 }
 0x24f   :  { %v908_v21 = vadd.f32 %v907_v17, %v906_v13  ;;  %v920_v22 = vadd.f32 %v919_v18, %v918_v14 }
 0x250   :  { %v903_v23 = vrot.slane %v902_v19, 1  ;;  %v915_v26 = vrot.slane %v914_v20, 1 }
 0x251   :  { %v909_v27 = vrot.slane %v908_v21, 1  ;;  %v921_v30 = vrot.slane %v920_v22, 1 }
 0x252   :  { %v904_v31 = vadd.f32 %v903_v23, %v902_v19  ;;  %v916_v32 = vadd.f32 %v915_v26, %v914_v20  ;;  %v1849_v23 = vsub.s32 2, %v1766_v1 }
 0x253   :  { %v910_v33 = vadd.f32 %v909_v27, %v908_v21  ;;  %v922_v34 = vadd.f32 %v921_v30, %v920_v22 }
 0x254   :  { %v923_v35 = vmul.f32 0.125, %v904_v31  ;;  %v925_v36 = vmul.f32 0.125, %v916_v32 }
 0x255   :  { %v924_v37 = vmul.f32 0.125, %v910_v33  ;;  %v926_v38 = vmul.f32 0.125, %v922_v34 }
 0x257   :  { %v941_v39 = vcombine.low %v923_v35, %v924_v37  ;;  %v942_v40 = vcombine.low %v925_v36, %v926_v38 }
 0x259   :  { %v943_v43 = vrot.slane %v941_v39, 5  ;;  %v944_v44 = vrot.slane %v942_v40, 5  ;;  %v1501_v39 = vld [vmem:[#allocation10] sm:$0xff]   ;;  %v1668_v40 = vmov 0.0  }
 0x25a   :  { %1439 = vmatprep.subr.bf16.mxu0 %v1668_v40 }
 0x25b   :  { %v947_v45 = vmul.f32 %v943_v43, %v935_v41  ;;  %v948_v46 = vmul.f32 %v944_v44, %v936_v42  ;;  %v1502_v41 = vld [vmem:[#allocation10 + $0x8] sm:$0xff]   ;;  %v1503_v42 = vld [vmem:[#allocation10 + $0x10] sm:$0xff]   ;;  %v1504_v43 = vld [vmem:[#allocation10 + $0x18] sm:$0xff]  }
 0x25c   :  { %v1505_v44 = vld [vmem:[#allocation10 + $0x20] sm:$0xff]  }
 0x25d   :  { %v949_v47 = vadd.f32 1e-05, %v947_v45  ;;  %v950_v48 = vadd.f32 1e-05, %v948_v46  ;;  %v1506_v45 = vld [vmem:[#allocation10 + $0x28] sm:$0xff]   ;;  %v1507_v46 = vld [vmem:[#allocation10 + $0x30] sm:$0xff]  }
 0x25f   :  { %1509 = vrsqrt.f32 %v949_v47  ;;  %v1508_v47 = vld [vmem:[#allocation10 + $0x38] sm:$0xff]  }
 0x260   :  { %1511 = vrsqrt.f32 %v950_v48  ;;  %v99_v48 = vld [vmem:[%s1883_s4] sm:$0x1f]  ;;  %s1670_s4 = smov [#allocation11]  }
 0x261   :  { %v1118_v50 = vrot.slane %v99_v48, %v1769_v2  ;;  %s1363_s3 = sshll.u32 %s1670_s4, 4  ;;  %s1364_s3 = int_to_ptr.vmem [resolvable:$true] %s1363_s3 }
 0x262   :  { %s1627_s11 = scalar_lea.vmem %s1364_s3, 128  ;;  %p1632_p13 = scmp.lt.s32.totalorder %s1364_s3, %s1364_s3 }
 0x263   :  { %p1628_p12 = scmp.ne.s32.totalorder %s1364_s3, %s1627_s11  ;;  %p1633_p0 = scmp.lt.s32.totalorder %s1627_s11, %s1627_s11 }
 0x265   :  { %p1634_p1 = por %p1633_p0, %p1632_p13 }
 0x267   :  { %p1635_p2 = pnand %p1634_p1, %p1628_p12 }
 0x269   :  { %v1510_v52 = vpop.eup %1509 }
 0x26a   :  { %v1512_v58 = vpop.eup %1511  ;;  %v1376_v59 = vrot.slane %v1510_v52, 10 }
 0x26b   :  { %v1377_v62 = vrot.slane %v1512_v58, 10 }
 0x26c   :  { %v961_v63 = vmul.f32 %v1376_v59, %v933_v51 }
 0x26d   :  { %v962_v0 = vmul.f32 %v1377_v62, %v934_v53 }
 0x26e   :  { %v968_v6 = vrot.slane %v961_v63, %v1831_v60  ;;  %v972_v7 = vrot.slane %v961_v63, %v971_v61 }
 0x26f   :  { %v976_v8 = vrot.slane %v962_v0, %v1831_v60  ;;  %v980_v9 = vrot.slane %v962_v0, %v971_v61 }
 0x270   :  { %v985_v10 = vmul.f32 %v968_v6, %v1806_v54  ;;  %v986_v11 = vmul.f32 %v972_v7, %v1810_v56  ;;  %v1008_v12 = vrot.slane %v972_v7, %v1831_v60  ;;  %v1004_v13 = vrot.slane %v968_v6, %v1831_v60 }
 0x271   :  { %v987_v14 = vmul.f32 %v976_v8, %v1808_v55  ;;  %v988_v15 = vmul.f32 %v980_v9, %v1812_v57  ;;  %v1016_v16 = vrot.slane %v980_v9, %v1831_v60  ;;  %v1012_v17 = vrot.slane %v976_v8, %v1831_v60 }
 0x272   :  { %v993_v18 = vcombine.low %v985_v10, %v986_v11  ;;  %v1018_v19 = vmul.f32 %v1008_v12, %v1794_v28  ;;  %v1017_v20 = vmul.f32 %v1004_v13, %v1790_v24  ;;  %v1029_v55 = vsub.s32 6, %v1766_v1 }
 0x273   :  { %v994_v54 = vcombine.low %v987_v14, %v988_v15  ;;  %v1020_v56 = vmul.f32 %v1016_v16, %v1796_v29  ;;  %v1019_v21 = vmul.f32 %v1012_v17, %v1792_v25 }
 0x274   :  { %v995_v22 = vrot.slane %v993_v18, 6 }
 0x275   :  { %v996_v57 = vrot.slane %v994_v54, 6 }
 0x276   :  { %v999_v26 = vsub.f32 %v1771_v3, %v995_v22 }
 0x277   :  { %v1000_v27 = vsub.f32 %v1773_v4, %v996_v57 }
 0x278   :  { %v1030_v30 = vrot.slane %v999_v26, %v1029_v55  ;;  %v1026_v28 = vrot.slane %v999_v26, %v1849_v23  ;;  %v1217_v26 = vrot.slane %v99_v48, 2 }
 0x279   :  { %v1038_v24 = vrot.slane %v1000_v27, %v1029_v55  ;;  %v1034_v31 = vrot.slane %v1000_v27, %v1849_v23 }
 0x27a   :  { %v1050_v29 = vrot.slane %v1030_v30, %v1849_v23  ;;  %v1046_v25 = vrot.slane %v1026_v28, %v1849_v23  ;;  %v1219_v27 = vmul.f32 %v1217_v26, %v99_v48 }
 0x27b   :  { %v1058_v32 = vrot.slane %v1038_v24, %v1849_v23  ;;  %v1054_v33 = vrot.slane %v1034_v31, %v1849_v23 }
 0x27c   :  { %v1060_v1 = vadd.f32 %v1050_v29, %v1018_v19  ;;  %v1059_v34 = vadd.f32 %v1046_v25, %v1017_v20 }
 0x27d   :  { %v1062_v35 = vadd.f32 %v1058_v32, %v1020_v56  ;;  %v1061_v3 = vadd.f32 %v1054_v33, %v1019_v21  ;;  %v1220_v21 = vmul.f32 %v99_v48, %v99_v48 }
 0x27e   :  { %v1112_v36 = vpack.c.bf16 %v1060_v1, %v1060_v1  ;;  %v1111_v4 = vpack.c.bf16 %v1059_v34, %v1059_v34 }
 0x27f   :  { %v1114_v37 = vpack.c.bf16 %v1062_v35, %v1062_v35  ;;  %v1113_v38 = vpack.c.bf16 %v1061_v3, %v1061_v3  ;;  %v1263_v3 = vrot.slane %v99_v48, %v1776_v5 }
 0x280   :  { %1151 = vmatprep.mubr.bf16.mxu0 %v1112_v36 }
 0x281   :  { %1191 = vmatprep.mubr.bf16.mxu1 %v1114_v37  ;;  %1152 = vmatmul.mubr.bf16.vlgmr.msra.gmra.mrb[4].mxu0 %v1111_v4 }
 0x282   :  { %1192 = vmatmul.mubr.bf16.vlgmr.msra.gmra.mrb[4].mxu1 %v1113_v38  ;;  %1455 = vmatprep.mubr.msk.bf16.mxu0 %vm1669_vm0, %v1668_v40 }
 0x283   :  { %1440 = vmatpush3.bf16.msra.mxu0 %v1501_v39 }
 0x284   :  { %1441 = vmatprep.subr.bf16.mxu0 %v1668_v40 }
 0x287   :  { %1442 = vmatpush3.bf16.msra.mxu0 %v1502_v41 }
 0x288   :  { %1443 = vmatprep.subr.bf16.mxu0 %v1668_v40 }
 0x28b   :  { %1444 = vmatpush3.bf16.msra.mxu0 %v1503_v42 }
 0x28c   :  { %1445 = vmatprep.subr.bf16.mxu0 %v1668_v40 }
 0x28f   :  { %1446 = vmatpush3.bf16.msra.mxu0 %v1504_v43 }
 0x290   :  { %1447 = vmatprep.subr.bf16.mxu0 %v1668_v40 }
 0x293   :  { %1448 = vmatpush3.bf16.msra.mxu0 %v1505_v44 }
 0x294   :  { %1449 = vmatprep.subr.bf16.mxu0 %v1668_v40 }
 0x297   :  { %1450 = vmatpush3.bf16.msra.mxu0 %v1506_v45 }
 0x298   :  { %1451 = vmatprep.subr.bf16.mxu0 %v1668_v40 }
 0x29b   :  { %1452 = vmatpush3.bf16.msra.mxu0 %v1507_v46 }
 0x29c   :  { %1453 = vmatprep.subr.bf16.mxu0 %v1668_v40 }
 0x29f   :  { %1454 = vmatpush3.bf16.msra.mxu0 %v1508_v47 }
 0x354   :  { %v1402_v49 = vpop.f32.mrb[4].mxu0 }
 0x355   :  { %v1424_v51 = vpop.f32.mrb[4].mxu1  ;;  %v1403_v52 = vpop.f32.mrb[5].mxu0 }
 0x356   :  { %v1404_v53 = vadd.f32 %v1403_v52, %v1402_v49  ;;  %v1425_v58 = vpop.f32.mrb[5].mxu1  ;;  %v1405_v59 = vpop.f32.mrb[6].mxu0 }
 0x357   :  { %v1426_v61 = vadd.f32 %v1425_v58, %v1424_v51  ;;  %v1427_v62 = vpop.f32.mrb[6].mxu1  ;;  %v1406_v63 = vpop.f32.mrb[7].mxu0 }
 0x358   :  { %v1154_v0 = vadd.f32 %v1404_v53, %v1118_v50  ;;  %v1428_v6 = vpop.f32.mrb[7].mxu1 }
 0x35a   :  { %v1194_v7 = vadd.f32 %v1426_v61, %v1154_v0 }
 0x35c   :  { %v1199_v8 = vmax.f32 %v1194_v7, 0.0 }
 0x35e   :  { %v1200_v9 = vrot.slane %v1199_v8, 4 }
 0x360   :  { %v1201_v10 = vadd.f32 %v1200_v9, %v1199_v8 }
 0x362   :  { %v1202_v11 = vrot.slane %v1201_v10, 2 }
 0x364   :  { %v1203_v12 = vadd.f32 %v1202_v11, %v1201_v10 }
 0x366   :  { %v1204_v13 = vrot.slane %v1203_v12, 1 }
 0x368   :  { %v1205_v14 = vadd.f32 %v1204_v13, %v1203_v12 }
 0x36a   :  { %v1206_v15 = vmul.f32 0.125, %v1205_v14 }
 0x36c   :  { %v1207_v2 = vsub.f32 %v1199_v8, %v1206_v15 }
 0x36e   :  { %v1208_v16 = vmul.f32 %v1207_v2, %v1207_v2 }
 0x370   :  { %v1209_v17 = vrot.slane %v1208_v16, 4 }
 0x372   :  { %v1210_v18 = vadd.f32 %v1209_v17, %v1208_v16 }
 0x374   :  { %v1211_v19 = vrot.slane %v1210_v18, 2 }
 0x376   :  { %v1212_v20 = vadd.f32 %v1211_v19, %v1210_v18 }
 0x378   :  { %v1213_v54 = vrot.slane %v1212_v20, 1 }
 0x37a   :  { %v1214_v56 = vadd.f32 %v1213_v54, %v1212_v20 }
 0x37c   :  { %v1215_v22 = vmul.f32 0.125, %v1214_v56 }
 0x37e   :  { %v1221_v55 = vmul.f32 %v1220_v21, %v1215_v22 }
 0x380   :  { %v1222_v57 = vadd.f32 1e-05, %v1221_v55 }
 0x382   :  { %1513 = vrsqrt.f32 %v1222_v57 }
 0x38c   :  { %v1514_v30 = vpop.eup %1513 }
 0x38d   :  { %v1225_v28 = vrot.slane %v1514_v30, 2 }
 0x38f   :  { %v1227_v24 = vmul.f32 %v1225_v28, %v1219_v27 }
 0x391   :  { %v1228_v31 = vmul.f32 %v1227_v24, %v1206_v15  ;;  %v1236_v25 = vrot.slane %v1227_v24, %v1831_v60 }
 0x393   :  { %v1230_v29 = vrot.slane %v1228_v31, 7  ;;  %v1237_v33 = vmul.f32 %v1236_v25, %v1199_v8 }
 0x395   :  { %v1232_v32 = vsub.f32 %v99_v48, %v1230_v29 }
 0x397   :  { %v1241_v1 = vrot.slane %v1232_v32, %v1849_v23 }
 0x399   :  { %v1242_v34 = vadd.f32 %v1241_v1, %v1237_v33 }
 0x39b   :  { %v1243_v35 = vpack.c.bf16 %v1242_v34, %v1242_v34 }
 0x39d   :  { %1456 = vmatmul.mubr.bf16.vlgmr.msra.gmra.mrb[8].mxu0 %v1243_v35 }
 0x470   :  { %v1346_v36 = vpop.f32.mrb[8].mxu0 }
 0x471   :  { %v1347_v4 = vadd.f32 %v1346_v36, %v1263_v3  ;;  %v1457_v37 = vpop.f32.mrb[9].mxu0 }
 0x472   :  { %v1349_v38 = vpop.f32.mrb[10].mxu0 }
 0x473   :  { %v1352_v39 = vmul.f32 0.5, %v1347_v4  ;;  %v1458_v40 = vpop.f32.mrb[11].mxu0 }
 0x475   :  { %1515 = vtanh.f32 %v1352_v39 }
 0x47f   :  { %v1516_v41 = vpop.eup %1515 }
 0x480   :  { %v1354_v60 = vadd.f32 1.0, %v1516_v41 }
 0x482   :  { %v1355_v42 = vmul.f32 0.5, %v1354_v60 }
 0x484   :  { %1356 = vst [vmem:[#allocation11] sm:$0xff] %v1355_v42 }
 0x485   :  { %1638 = shalt.err (!%p1635_p2)
}
 0x486   :  { %s1639_s14 = scalar_lea.hbm %s1885_s6, 128 }
 0x487   :  { %p1640_p3 = scmp.ne.s32.totalorder %s1885_s6, %s1639_s14  ;;  %p1643_p4 = scmp.lt.u32.totalorder %s1639_s14, %s1885_s6 }
 0x489   :  { %p1645_p5 = pnand %p1643_p4, %p1640_p3 }
 0x48b   :  { %1648 = shalt.err (!%p1645_p5)
}
 0x48c   :  { %1366 = dma.vmem_to_hbm [thread:$0]  %s1364_s3, 128, %s1885_s6, [#allocation4]  }
 0x48d   :  { %1655 = dma.done.wait [#allocation4], 128  }
 0x48e   :  { %1656 = vsyncadd [#allocation4], 4294967168 }
 0x48f   :  { %1370 = vsyncpa [#allocation3], 1 }
 0x490   :  { %1371 = vsyncpa [#allocation6], 1 }
 0x491   :  { %1372 = vsyncpa [#allocation9], 1 }
 0x492   :  { %1373 = vsyncpa [#allocation4], 1 }

</bundles_post_ra>
